<compile_context>
chip_gen: v7x
topology: tpu7x:2x2x1
jax: 0.10.0
libtpu: 0.0.40
codegen_flags: <defaults>
</compile_context>

<pallas_src>
import jax
import jax.numpy as jnp
import numpy as np
from jax import lax
from jax.experimental import pallas as pl
from jax.experimental.pallas import tpu as pltpu

C_IN = 3          # RGB input channels (fixed by the module)
C_IN_PAD = 8      # pad input channels to 8 for a clean MXU / lane layout
C1, C2, C3 = 32, 64, 128


def _round_up(x, m):
    return (x + m - 1) // m * m


def _build_fused_call(n, h, w):
    """Build the fused pallas_call for batch n and input spatial size (h, w)."""
    assert h % 8 == 0 and w % 8 == 0, "spatial dims must be multiples of 8"

    # per-layer spatial sizes (conv keeps size, pool halves it)
    h1, w1 = h, w
    h2, w2 = h1 // 2, w1 // 2
    h3, w3 = h2 // 2, w2 // 2
    ho, wo = h3 // 2, w3 // 2                      # final output spatial

    # sublane-friendly working widths (>= real width, multiple of 8)
    ws1, ws2, ws3 = _round_up(w1, 8), _round_up(w2, 8), _round_up(w3, 8)

    def conv3x3_relu(load_window, w_ref, b_ref, hh, ws, cout):
        """9-tap conv as accumulated MXU matmuls, fused bias + ReLU.

        load_window(ky, kx) -> (hh, ws, cin) f32 window of the padded input.
        Returns (hh, ws, cout) f32; only the real (unpadded) columns are valid.
        """
        acc = jnp.zeros((hh * ws, cout), jnp.float32)
        tap = 0
        for ky in range(3):
            for kx in range(3):
                patch = load_window(ky, kx).reshape(hh * ws, -1)   # f32, no-op
                acc = acc + jnp.dot(patch.astype(jnp.bfloat16), w_ref[tap],
                                    preferred_element_type=jnp.float32)
                tap += 1
        acc = acc + b_ref[...].astype(jnp.float32)
        return jnp.maximum(acc, 0.0).reshape(hh, ws, cout)

    def pool2x2(y, hh, ww, ws, cout, store_col):
        """2x2/2 max pool of y (hh, ws, cout); valid columns are [0, ww).

        store_col(c, col) receives pooled column c as an (hh//2, 1, cout) value.
        """
        y4 = y.reshape(hh // 2, 2, ws, cout)            # leading-dim split
        v = jnp.maximum(y4[:, 0], y4[:, 1])             # vertical max
        for c in range(ww // 2):
            col = jnp.maximum(v[:, 2 * c:2 * c + 1, :],
                              v[:, 2 * c + 1:2 * c + 2, :])
            store_col(c, col)

    def kernel(x_ref, w1_ref, b1_ref, w2_ref, b2_ref, w3_ref, b3_ref,
               o_ref, p1_ref, p2_ref):
        # zero padded scratch activations (padding ring + spare columns)
        p1_ref[...] = jnp.zeros(p1_ref.shape, p1_ref.dtype)
        p2_ref[...] = jnp.zeros(p2_ref.shape, p2_ref.dtype)

        # ---- layer 1: conv(C_IN_PAD -> 32) + ReLU + pool  (h1 x w1 -> h2 x w2)
        y1 = conv3x3_relu(
            lambda ky, kx: x_ref[0, ky:ky + h1, kx:kx + ws1, :],
            w1_ref, b1_ref, h1, ws1, C1)

        def store1(c, col):
            p1_ref[1:1 + h2, c + 1:c + 2, :] = col
        pool2x2(y1, h1, w1, ws1, C1, store1)

        # ---- layer 2: conv(32 -> 64) + ReLU + pool        (h2 x w2 -> h3 x w3)
        y2 = conv3x3_relu(
            lambda ky, kx: p1_ref[ky:ky + h2, kx:kx + ws2, :],
            w2_ref, b2_ref, h2, ws2, C2)

        def store2(c, col):
            p2_ref[1:1 + h3, c + 1:c + 2, :] = col
        pool2x2(y2, h2, w2, ws2, C2, store2)

        # ---- layer 3: conv(64 -> 128) + ReLU + pool       (h3 x w3 -> ho x wo)
        y3 = conv3x3_relu(
            lambda ky, kx: p2_ref[ky:ky + h3, kx:kx + ws3, :],
            w3_ref, b3_ref, h3, ws3, C3)

        def store3(c, col):
            o_ref[0, :, c:c + 1, :] = col
        pool2x2(y3, h3, w3, ws3, C3, store3)

    grid_spec = pltpu.PrefetchScalarGridSpec(
        num_scalar_prefetch=0,
        grid=(n,),
        in_specs=[
            # one padded image per grid step (auto double-buffered)
            pl.BlockSpec((1, h1 + 2, ws1 + 2, C_IN_PAD),
                         lambda i: (i, 0, 0, 0)),
            # weights / biases: constant index maps -> stay VMEM-resident
            pl.BlockSpec((9, C_IN_PAD, C1), lambda i: (0, 0, 0)),
            pl.BlockSpec((1, C1), lambda i: (0, 0)),
            pl.BlockSpec((9, C1, C2), lambda i: (0, 0, 0)),
            pl.BlockSpec((1, C2), lambda i: (0, 0)),
            pl.BlockSpec((9, C2, C3), lambda i: (0, 0, 0)),
            pl.BlockSpec((1, C3), lambda i: (0, 0)),
        ],
        out_specs=pl.BlockSpec((1, ho, wo, C3), lambda i: (i, 0, 0, 0)),
        scratch_shapes=[
            pltpu.VMEM((h2 + 2, ws2 + 2, C1), jnp.float32),  # padded pool-1 out
            pltpu.VMEM((h3 + 2, ws3 + 2, C2), jnp.float32),  # padded pool-2 out
        ],
    )

    return pl.pallas_call(
        kernel,
        out_shape=jax.ShapeDtypeStruct((n, ho, wo, C3), jnp.float32),
        grid_spec=grid_spec,
        compiler_params=pltpu.CompilerParams(
            dimension_semantics=("parallel",),   # batch across TensorCores
            vmem_limit_bytes=32 * 1024 * 1024,
        ),
    )


# ------------------------------ params / wrapper -----------------------------

def init_params(key):
    """Deterministic init mimicking PyTorch Conv2d defaults (U(+-1/sqrt(fan_in)))."""
    params = {}
    layer_dims = [(C_IN, C1), (C1, C2), (C2, C3)]
    for li, (cin, cout) in enumerate(layer_dims):
        key, kw, kb = jax.random.split(key, 3)
        bound = 1.0 / np.sqrt(cin * 9)
        params[f"w{li}"] = jax.random.uniform(
            kw, (cout, cin, 3, 3), jnp.float32, -bound, bound)
        params[f"b{li}"] = jax.random.uniform(
            kb, (cout,), jnp.float32, -bound, bound)
    return params


def _prep_weight(w_oihw, cin_pad):
    """(Cout, Cin, 3, 3) -> (9, cin_pad, Cout) bf16, tap-major (ky, kx)."""
    cout, cin = w_oihw.shape[0], w_oihw.shape[1]
    wm = jnp.transpose(w_oihw, (2, 3, 1, 0)).reshape(9, cin, cout)
    if cin_pad > cin:
        wm = jnp.pad(wm, ((0, 0), (0, cin_pad - cin), (0, 0)))
    return wm.astype(jnp.bfloat16)


@jax.jit
def cnn_feature_extractor(params, x_nchw):
    """Forward pass equivalent to the PyTorch module. x_nchw: (N, 3, H, W) f32."""
    n, _, h, w = x_nchw.shape
    x = jnp.transpose(x_nchw, (0, 2, 3, 1))                          # NHWC
    x = jnp.pad(x, ((0, 0), (1, 1), (1, 1), (0, C_IN_PAD - C_IN)))   # pad H,W,C

    w1 = _prep_weight(params["w0"], C_IN_PAD)
    w2 = _prep_weight(params["w1"], C1)
    w3 = _prep_weight(params["w2"], C2)
    b1 = params["b0"].reshape(1, C1)
    b2 = params["b1"].reshape(1, C2)
    b3 = params["b2"].reshape(1, C3)

    out_nhwc = _build_fused_call(n, h, w)(x, w1, b1, w2, b2, w3, b3)
    return jnp.transpose(out_nhwc, (0, 3, 1, 2))                     # -> NCHW


def _reference_forward(params, x_nchw):
    """Pure-JAX (XLA) reference of the PyTorch module, f32 end to end."""
    x = jnp.transpose(x_nchw, (0, 2, 3, 1))
    for li in range(3):
        wt = jnp.transpose(params[f"w{li}"], (2, 3, 1, 0))           # HWIO
        x = lax.conv_general_dilated(
            x, wt, window_strides=(1, 1), padding=((1, 1), (1, 1)),
            dimension_numbers=("NHWC", "HWIO", "NHWC"))
        x = jnp.maximum(x + params[f"b{li}"], 0.0)
        x = lax.reduce_window(x, -jnp.inf, lax.max,
                              (1, 2, 2, 1), (1, 2, 2, 1), "VALID")
    return jnp.transpose(x, (0, 3, 1, 2))


if __name__ == "__main__":
    key = jax.random.PRNGKey(0)
    key, kx = jax.random.split(key)

    # Input: batch=2, channels=3 (fixed by the module), spatial=16x16.
    x = jax.random.normal(kx, (2, 3, 16, 16), jnp.float32)
    params = init_params(key)

    out = cnn_feature_extractor(params, x)
    out = jax.block_until_ready(out)

    assert out.shape == (2, 128, 2, 2), out.shape
    assert out.dtype == jnp.float32

    # loose check vs XLA reference (kernel matmuls run in bf16)
    ref = _reference_forward(params, x)
    np.testing.assert_allclose(np.asarray(out), np.asarray(ref),
                               rtol=1e-1, atol=1e-1)

    print("KERNEL_OK")
</pallas_src>

<mosaic_0001>
module attributes {stable_mosaic.version = 11 : i64} {
  func.func @kernel(%arg0: i32, %arg1: memref<1x18x18x8xf32, #tpu.memory_space<vmem>>, %arg2: memref<9x8x32xbf16, #tpu.memory_space<vmem>>, %arg3: memref<1x32xf32, #tpu.memory_space<vmem>>, %arg4: memref<9x32x64xbf16, #tpu.memory_space<vmem>>, %arg5: memref<1x64xf32, #tpu.memory_space<vmem>>, %arg6: memref<9x64x128xbf16, #tpu.memory_space<vmem>>, %arg7: memref<1x128xf32, #tpu.memory_space<vmem>>, %arg8: memref<1x2x2x128xf32, #tpu.memory_space<vmem>>, %arg9: memref<10x10x32xf32, #tpu.memory_space<vmem>>, %arg10: memref<6x10x64xf32, #tpu.memory_space<vmem>>) attributes {dimension_semantics = [#tpu.dimension_semantics<parallel>], iteration_bounds = array<i64: 2>, scalar_prefetch = 0 : i64, scratch_operands = 2 : i64, tpu.core_type = #tpu.core_type<tc>, window_params = [{transform_indices = @transform_0, window_bounds = array<i64: 1, 18, 18, 8>}, {pipeline_mode = #tpu.pipeline_mode<synchronous>, transform_indices = @transform_1, window_bounds = array<i64: 9, 8, 32>}, {pipeline_mode = #tpu.pipeline_mode<synchronous>, transform_indices = @transform_2, window_bounds = array<i64: 1, 32>}, {pipeline_mode = #tpu.pipeline_mode<synchronous>, transform_indices = @transform_3, window_bounds = array<i64: 9, 32, 64>}, {pipeline_mode = #tpu.pipeline_mode<synchronous>, transform_indices = @transform_4, window_bounds = array<i64: 1, 64>}, {pipeline_mode = #tpu.pipeline_mode<synchronous>, transform_indices = @transform_5, window_bounds = array<i64: 9, 64, 128>}, {pipeline_mode = #tpu.pipeline_mode<synchronous>, transform_indices = @transform_6, window_bounds = array<i64: 1, 128>}, {transform_indices = @transform_7, window_bounds = array<i64: 1, 2, 2, 128>}]} {
    %cst = arith.constant 0.000000e+00 : f32
    %0 = vector.broadcast %cst : f32 to vector<10x10x32xf32>
    %c0 = arith.constant 0 : index
    %c0_0 = arith.constant 0 : index
    %c0_1 = arith.constant 0 : index
    %1 = vector.load %arg9[%c0, %c0_0, %c0_1] : memref<10x10x32xf32, #tpu.memory_space<vmem>>, vector<10x10x32xf32>
    tpu.vector_store %arg9[%c0, %c0_0, %c0_1], %0 {strides = array<i32>} : memref<10x10x32xf32, #tpu.memory_space<vmem>>, vector<10x10x32xf32>,
    %cst_2 = arith.constant 0.000000e+00 : f32
    %2 = vector.broadcast %cst_2 : f32 to vector<6x10x64xf32>
    %c0_3 = arith.constant 0 : index
    %c0_4 = arith.constant 0 : index
    %c0_5 = arith.constant 0 : index
    %3 = vector.load %arg10[%c0_3, %c0_4, %c0_5] : memref<6x10x64xf32, #tpu.memory_space<vmem>>, vector<6x10x64xf32>
    tpu.vector_store %arg10[%c0_3, %c0_4, %c0_5], %2 {strides = array<i32>} : memref<6x10x64xf32, #tpu.memory_space<vmem>>, vector<6x10x64xf32>,
    %cst_6 = arith.constant 0.000000e+00 : f32
    %4 = vector.broadcast %cst_6 : f32 to vector<256x32xf32>
    %c0_7 = arith.constant 0 : index
    %c0_8 = arith.constant 0 : index
    %c0_9 = arith.constant 0 : index
    %c0_10 = arith.constant 0 : index
    %5 = vector.load %arg1[%c0_7, %c0_8, %c0_9, %c0_10] : memref<1x18x18x8xf32, #tpu.memory_space<vmem>>, vector<1x16x16x8xf32>
    %6 = vector.shape_cast %5 : vector<1x16x16x8xf32> to vector<16x16x8xf32>
    %7 = vector.shape_cast %6 : vector<16x16x8xf32> to vector<256x8xf32>
    %8 = arith.truncf %7 : vector<256x8xf32> to vector<256x8xbf16>
    %c0_11 = arith.constant 0 : index
    %c0_12 = arith.constant 0 : index
    %c0_13 = arith.constant 0 : index
    %9 = vector.load %arg2[%c0_11, %c0_12, %c0_13] : memref<9x8x32xbf16, #tpu.memory_space<vmem>>, vector<1x8x32xbf16>
    %10 = vector.shape_cast %9 : vector<1x8x32xbf16> to vector<8x32xbf16>
    %cst_14 = arith.constant dense<0.000000e+00> : vector<256x32xf32>
    %11 = tpu.matmul %8, %10, %cst_14 {dimension_numbers = #tpu.dot_dimension_numbers<[1], [0], [0], [1], [0, 0, 1, 1], [], []>} : vector<256x8xbf16>, vector<8x32xbf16>, vector<256x32xf32> -> vector<256x32xf32>
    %12 = arith.addf %4, %11 : vector<256x32xf32>
    %c0_15 = arith.constant 0 : index
    %c0_16 = arith.constant 0 : index
    %c1 = arith.constant 1 : index
    %c0_17 = arith.constant 0 : index
    %13 = vector.load %arg1[%c0_15, %c0_16, %c1, %c0_17] : memref<1x18x18x8xf32, #tpu.memory_space<vmem>>, vector<1x16x16x8xf32>
    %14 = vector.shape_cast %13 : vector<1x16x16x8xf32> to vector<16x16x8xf32>
    %15 = vector.shape_cast %14 : vector<16x16x8xf32> to vector<256x8xf32>
    %16 = arith.truncf %15 : vector<256x8xf32> to vector<256x8xbf16>
    %c1_18 = arith.constant 1 : index
    %c0_19 = arith.constant 0 : index
    %c0_20 = arith.constant 0 : index
    %17 = vector.load %arg2[%c1_18, %c0_19, %c0_20] : memref<9x8x32xbf16, #tpu.memory_space<vmem>>, vector<1x8x32xbf16>
    %18 = vector.shape_cast %17 : vector<1x8x32xbf16> to vector<8x32xbf16>
    %cst_21 = arith.constant dense<0.000000e+00> : vector<256x32xf32>
    %19 = tpu.matmul %16, %18, %cst_21 {dimension_numbers = #tpu.dot_dimension_numbers<[1], [0], [0], [1], [0, 0, 1, 1], [], []>} : vector<256x8xbf16>, vector<8x32xbf16>, vector<256x32xf32> -> vector<256x32xf32>
    %20 = arith.addf %12, %19 : vector<256x32xf32>
    %c0_22 = arith.constant 0 : index
    %c0_23 = arith.constant 0 : index
    %c2 = arith.constant 2 : index
    %c0_24 = arith.constant 0 : index
    %21 = vector.load %arg1[%c0_22, %c0_23, %c2, %c0_24] : memref<1x18x18x8xf32, #tpu.memory_space<vmem>>, vector<1x16x16x8xf32>
    %22 = vector.shape_cast %21 : vector<1x16x16x8xf32> to vector<16x16x8xf32>
    %23 = vector.shape_cast %22 : vector<16x16x8xf32> to vector<256x8xf32>
    %24 = arith.truncf %23 : vector<256x8xf32> to vector<256x8xbf16>
    %c2_25 = arith.constant 2 : index
    %c0_26 = arith.constant 0 : index
    %c0_27 = arith.constant 0 : index
    %25 = vector.load %arg2[%c2_25, %c0_26, %c0_27] : memref<9x8x32xbf16, #tpu.memory_space<vmem>>, vector<1x8x32xbf16>
    %26 = vector.shape_cast %25 : vector<1x8x32xbf16> to vector<8x32xbf16>
    %cst_28 = arith.constant dense<0.000000e+00> : vector<256x32xf32>
    %27 = tpu.matmul %24, %26, %cst_28 {dimension_numbers = #tpu.dot_dimension_numbers<[1], [0], [0], [1], [0, 0, 1, 1], [], []>} : vector<256x8xbf16>, vector<8x32xbf16>, vector<256x32xf32> -> vector<256x32xf32>
    %28 = arith.addf %20, %27 : vector<256x32xf32>
    %c0_29 = arith.constant 0 : index
    %c1_30 = arith.constant 1 : index
    %c0_31 = arith.constant 0 : index
    %c0_32 = arith.constant 0 : index
    %29 = vector.load %arg1[%c0_29, %c1_30, %c0_31, %c0_32] : memref<1x18x18x8xf32, #tpu.memory_space<vmem>>, vector<1x16x16x8xf32>
    %30 = vector.shape_cast %29 : vector<1x16x16x8xf32> to vector<16x16x8xf32>
    %31 = vector.shape_cast %30 : vector<16x16x8xf32> to vector<256x8xf32>
    %32 = arith.truncf %31 : vector<256x8xf32> to vector<256x8xbf16>
    %c3 = arith.constant 3 : index
    %c0_33 = arith.constant 0 : index
    %c0_34 = arith.constant 0 : index
    %33 = vector.load %arg2[%c3, %c0_33, %c0_34] : memref<9x8x32xbf16, #tpu.memory_space<vmem>>, vector<1x8x32xbf16>
    %34 = vector.shape_cast %33 : vector<1x8x32xbf16> to vector<8x32xbf16>
    %cst_35 = arith.constant dense<0.000000e+00> : vector<256x32xf32>
    %35 = tpu.matmul %32, %34, %cst_35 {dimension_numbers = #tpu.dot_dimension_numbers<[1], [0], [0], [1], [0, 0, 1, 1], [], []>} : vector<256x8xbf16>, vector<8x32xbf16>, vector<256x32xf32> -> vector<256x32xf32>
    %36 = arith.addf %28, %35 : vector<256x32xf32>
    %c0_36 = arith.constant 0 : index
    %c1_37 = arith.constant 1 : index
    %c1_38 = arith.constant 1 : index
    %c0_39 = arith.constant 0 : index
    %37 = vector.load %arg1[%c0_36, %c1_37, %c1_38, %c0_39] : memref<1x18x18x8xf32, #tpu.memory_space<vmem>>, vector<1x16x16x8xf32>
    %38 = vector.shape_cast %37 : vector<1x16x16x8xf32> to vector<16x16x8xf32>
    %39 = vector.shape_cast %38 : vector<16x16x8xf32> to vector<256x8xf32>
    %40 = arith.truncf %39 : vector<256x8xf32> to vector<256x8xbf16>
    %c4 = arith.constant 4 : index
    %c0_40 = arith.constant 0 : index
    %c0_41 = arith.constant 0 : index
    %41 = vector.load %arg2[%c4, %c0_40, %c0_41] : memref<9x8x32xbf16, #tpu.memory_space<vmem>>, vector<1x8x32xbf16>
    %42 = vector.shape_cast %41 : vector<1x8x32xbf16> to vector<8x32xbf16>
    %cst_42 = arith.constant dense<0.000000e+00> : vector<256x32xf32>
    %43 = tpu.matmul %40, %42, %cst_42 {dimension_numbers = #tpu.dot_dimension_numbers<[1], [0], [0], [1], [0, 0, 1, 1], [], []>} : vector<256x8xbf16>, vector<8x32xbf16>, vector<256x32xf32> -> vector<256x32xf32>
    %44 = arith.addf %36, %43 : vector<256x32xf32>
    %c0_43 = arith.constant 0 : index
    %c1_44 = arith.constant 1 : index
    %c2_45 = arith.constant 2 : index
    %c0_46 = arith.constant 0 : index
    %45 = vector.load %arg1[%c0_43, %c1_44, %c2_45, %c0_46] : memref<1x18x18x8xf32, #tpu.memory_space<vmem>>, vector<1x16x16x8xf32>
    %46 = vector.shape_cast %45 : vector<1x16x16x8xf32> to vector<16x16x8xf32>
    %47 = vector.shape_cast %46 : vector<16x16x8xf32> to vector<256x8xf32>
    %48 = arith.truncf %47 : vector<256x8xf32> to vector<256x8xbf16>
    %c5 = arith.constant 5 : index
    %c0_47 = arith.constant 0 : index
    %c0_48 = arith.constant 0 : index
    %49 = vector.load %arg2[%c5, %c0_47, %c0_48] : memref<9x8x32xbf16, #tpu.memory_space<vmem>>, vector<1x8x32xbf16>
    %50 = vector.shape_cast %49 : vector<1x8x32xbf16> to vector<8x32xbf16>
    %cst_49 = arith.constant dense<0.000000e+00> : vector<256x32xf32>
    %51 = tpu.matmul %48, %50, %cst_49 {dimension_numbers = #tpu.dot_dimension_numbers<[1], [0], [0], [1], [0, 0, 1, 1], [], []>} : vector<256x8xbf16>, vector<8x32xbf16>, vector<256x32xf32> -> vector<256x32xf32>
    %52 = arith.addf %44, %51 : vector<256x32xf32>
    %c0_50 = arith.constant 0 : index
    %c2_51 = arith.constant 2 : index
    %c0_52 = arith.constant 0 : index
    %c0_53 = arith.constant 0 : index
    %53 = vector.load %arg1[%c0_50, %c2_51, %c0_52, %c0_53] : memref<1x18x18x8xf32, #tpu.memory_space<vmem>>, vector<1x16x16x8xf32>
    %54 = vector.shape_cast %53 : vector<1x16x16x8xf32> to vector<16x16x8xf32>
    %55 = vector.shape_cast %54 : vector<16x16x8xf32> to vector<256x8xf32>
    %56 = arith.truncf %55 : vector<256x8xf32> to vector<256x8xbf16>
    %c6 = arith.constant 6 : index
    %c0_54 = arith.constant 0 : index
    %c0_55 = arith.constant 0 : index
    %57 = vector.load %arg2[%c6, %c0_54, %c0_55] : memref<9x8x32xbf16, #tpu.memory_space<vmem>>, vector<1x8x32xbf16>
    %58 = vector.shape_cast %57 : vector<1x8x32xbf16> to vector<8x32xbf16>
    %cst_56 = arith.constant dense<0.000000e+00> : vector<256x32xf32>
    %59 = tpu.matmul %56, %58, %cst_56 {dimension_numbers = #tpu.dot_dimension_numbers<[1], [0], [0], [1], [0, 0, 1, 1], [], []>} : vector<256x8xbf16>, vector<8x32xbf16>, vector<256x32xf32> -> vector<256x32xf32>
    %60 = arith.addf %52, %59 : vector<256x32xf32>
    %c0_57 = arith.constant 0 : index
    %c2_58 = arith.constant 2 : index
    %c1_59 = arith.constant 1 : index
    %c0_60 = arith.constant 0 : index
    %61 = vector.load %arg1[%c0_57, %c2_58, %c1_59, %c0_60] : memref<1x18x18x8xf32, #tpu.memory_space<vmem>>, vector<1x16x16x8xf32>
    %62 = vector.shape_cast %61 : vector<1x16x16x8xf32> to vector<16x16x8xf32>
    %63 = vector.shape_cast %62 : vector<16x16x8xf32> to vector<256x8xf32>
    %64 = arith.truncf %63 : vector<256x8xf32> to vector<256x8xbf16>
    %c7 = arith.constant 7 : index
    %c0_61 = arith.constant 0 : index
    %c0_62 = arith.constant 0 : index
    %65 = vector.load %arg2[%c7, %c0_61, %c0_62] : memref<9x8x32xbf16, #tpu.memory_space<vmem>>, vector<1x8x32xbf16>
    %66 = vector.shape_cast %65 : vector<1x8x32xbf16> to vector<8x32xbf16>
    %cst_63 = arith.constant dense<0.000000e+00> : vector<256x32xf32>
    %67 = tpu.matmul %64, %66, %cst_63 {dimension_numbers = #tpu.dot_dimension_numbers<[1], [0], [0], [1], [0, 0, 1, 1], [], []>} : vector<256x8xbf16>, vector<8x32xbf16>, vector<256x32xf32> -> vector<256x32xf32>
    %68 = arith.addf %60, %67 : vector<256x32xf32>
    %c0_64 = arith.constant 0 : index
    %c2_65 = arith.constant 2 : index
    %c2_66 = arith.constant 2 : index
    %c0_67 = arith.constant 0 : index
    %69 = vector.load %arg1[%c0_64, %c2_65, %c2_66, %c0_67] : memref<1x18x18x8xf32, #tpu.memory_space<vmem>>, vector<1x16x16x8xf32>
    %70 = vector.shape_cast %69 : vector<1x16x16x8xf32> to vector<16x16x8xf32>
    %71 = vector.shape_cast %70 : vector<16x16x8xf32> to vector<256x8xf32>
    %72 = arith.truncf %71 : vector<256x8xf32> to vector<256x8xbf16>
    %c8 = arith.constant 8 : index
    %c0_68 = arith.constant 0 : index
    %c0_69 = arith.constant 0 : index
    %73 = vector.load %arg2[%c8, %c0_68, %c0_69] : memref<9x8x32xbf16, #tpu.memory_space<vmem>>, vector<1x8x32xbf16>
    %74 = vector.shape_cast %73 : vector<1x8x32xbf16> to vector<8x32xbf16>
    %cst_70 = arith.constant dense<0.000000e+00> : vector<256x32xf32>
    %75 = tpu.matmul %72, %74, %cst_70 {dimension_numbers = #tpu.dot_dimension_numbers<[1], [0], [0], [1], [0, 0, 1, 1], [], []>} : vector<256x8xbf16>, vector<8x32xbf16>, vector<256x32xf32> -> vector<256x32xf32>
    %76 = arith.addf %68, %75 : vector<256x32xf32>
    %c0_71 = arith.constant 0 : index
    %c0_72 = arith.constant 0 : index
    %77 = vector.load %arg3[%c0_71, %c0_72] : memref<1x32xf32, #tpu.memory_space<vmem>>, vector<1x32xf32>
    %78 = vector.broadcast %77 : vector<1x32xf32> to vector<256x32xf32>
    %79 = arith.addf %76, %78 : vector<256x32xf32>
    %cst_73 = arith.constant 0.000000e+00 : f32
    %80 = vector.broadcast %cst_73 : f32 to vector<256x32xf32>
    %81 = arith.maximumf %79, %80 : vector<256x32xf32>
    %82 = vector.shape_cast %81 : vector<256x32xf32> to vector<16x16x32xf32>
    %83 = vector.shape_cast %82 : vector<16x16x32xf32> to vector<8x2x16x32xf32>
    %84 = vector.extract_strided_slice %83 {offsets = [0, 0, 0, 0], sizes = [8, 1, 16, 32], strides = [1, 1, 1, 1]} : vector<8x2x16x32xf32> to vector<8x1x16x32xf32>
    %85 = vector.shape_cast %84 : vector<8x1x16x32xf32> to vector<8x16x32xf32>
    %86 = vector.extract_strided_slice %83 {offsets = [0, 1, 0, 0], sizes = [8, 1, 16, 32], strides = [1, 1, 1, 1]} : vector<8x2x16x32xf32> to vector<8x1x16x32xf32>
    %87 = vector.shape_cast %86 : vector<8x1x16x32xf32> to vector<8x16x32xf32>
    %88 = arith.maximumf %85, %87 : vector<8x16x32xf32>
    %89 = vector.extract_strided_slice %88 {offsets = [0, 0, 0], sizes = [8, 1, 32], strides = [1, 1, 1]} : vector<8x16x32xf32> to vector<8x1x32xf32>
    %90 = vector.extract_strided_slice %88 {offsets = [0, 1, 0], sizes = [8, 1, 32], strides = [1, 1, 1]} : vector<8x16x32xf32> to vector<8x1x32xf32>
    %91 = arith.maximumf %89, %90 : vector<8x1x32xf32>
    %c1_74 = arith.constant 1 : index
    %c1_75 = arith.constant 1 : index
    %c0_76 = arith.constant 0 : index
    %92 = vector.load %arg9[%c1_74, %c1_75, %c0_76] : memref<10x10x32xf32, #tpu.memory_space<vmem>>, vector<8x1x32xf32>
    tpu.vector_store %arg9[%c1_74, %c1_75, %c0_76], %91 {strides = array<i32>} : memref<10x10x32xf32, #tpu.memory_space<vmem>>, vector<8x1x32xf32>,
    %93 = vector.extract_strided_slice %88 {offsets = [0, 2, 0], sizes = [8, 1, 32], strides = [1, 1, 1]} : vector<8x16x32xf32> to vector<8x1x32xf32>
    %94 = vector.extract_strided_slice %88 {offsets = [0, 3, 0], sizes = [8, 1, 32], strides = [1, 1, 1]} : vector<8x16x32xf32> to vector<8x1x32xf32>
    %95 = arith.maximumf %93, %94 : vector<8x1x32xf32>
    %c1_77 = arith.constant 1 : index
    %c2_78 = arith.constant 2 : index
    %c0_79 = arith.constant 0 : index
    %96 = vector.load %arg9[%c1_77, %c2_78, %c0_79] : memref<10x10x32xf32, #tpu.memory_space<vmem>>, vector<8x1x32xf32>
    tpu.vector_store %arg9[%c1_77, %c2_78, %c0_79], %95 {strides = array<i32>} : memref<10x10x32xf32, #tpu.memory_space<vmem>>, vector<8x1x32xf32>,
    %97 = vector.extract_strided_slice %88 {offsets = [0, 4, 0], sizes = [8, 1, 32], strides = [1, 1, 1]} : vector<8x16x32xf32> to vector<8x1x32xf32>
    %98 = vector.extract_strided_slice %88 {offsets = [0, 5, 0], sizes = [8, 1, 32], strides = [1, 1, 1]} : vector<8x16x32xf32> to vector<8x1x32xf32>
    %99 = arith.maximumf %97, %98 : vector<8x1x32xf32>
    %c1_80 = arith.constant 1 : index
    %c3_81 = arith.constant 3 : index
    %c0_82 = arith.constant 0 : index
    %100 = vector.load %arg9[%c1_80, %c3_81, %c0_82] : memref<10x10x32xf32, #tpu.memory_space<vmem>>, vector<8x1x32xf32>
    tpu.vector_store %arg9[%c1_80, %c3_81, %c0_82], %99 {strides = array<i32>} : memref<10x10x32xf32, #tpu.memory_space<vmem>>, vector<8x1x32xf32>,
    %101 = vector.extract_strided_slice %88 {offsets = [0, 6, 0], sizes = [8, 1, 32], strides = [1, 1, 1]} : vector<8x16x32xf32> to vector<8x1x32xf32>
    %102 = vector.extract_strided_slice %88 {offsets = [0, 7, 0], sizes = [8, 1, 32], strides = [1, 1, 1]} : vector<8x16x32xf32> to vector<8x1x32xf32>
    %103 = arith.maximumf %101, %102 : vector<8x1x32xf32>
    %c1_83 = arith.constant 1 : index
    %c4_84 = arith.constant 4 : index
    %c0_85 = arith.constant 0 : index
    %104 = vector.load %arg9[%c1_83, %c4_84, %c0_85] : memref<10x10x32xf32, #tpu.memory_space<vmem>>, vector<8x1x32xf32>
    tpu.vector_store %arg9[%c1_83, %c4_84, %c0_85], %103 {strides = array<i32>} : memref<10x10x32xf32, #tpu.memory_space<vmem>>, vector<8x1x32xf32>,
    %105 = vector.extract_strided_slice %88 {offsets = [0, 8, 0], sizes = [8, 1, 32], strides = [1, 1, 1]} : vector<8x16x32xf32> to vector<8x1x32xf32>
    %106 = vector.extract_strided_slice %88 {offsets = [0, 9, 0], sizes = [8, 1, 32], strides = [1, 1, 1]} : vector<8x16x32xf32> to vector<8x1x32xf32>
    %107 = arith.maximumf %105, %106 : vector<8x1x32xf32>
    %c1_86 = arith.constant 1 : index
    %c5_87 = arith.constant 5 : index
    %c0_88 = arith.constant 0 : index
    %108 = vector.load %arg9[%c1_86, %c5_87, %c0_88] : memref<10x10x32xf32, #tpu.memory_space<vmem>>, vector<8x1x32xf32>
    tpu.vector_store %arg9[%c1_86, %c5_87, %c0_88], %107 {strides = array<i32>} : memref<10x10x32xf32, #tpu.memory_space<vmem>>, vector<8x1x32xf32>,
    %109 = vector.extract_strided_slice %88 {offsets = [0, 10, 0], sizes = [8, 1, 32], strides = [1, 1, 1]} : vector<8x16x32xf32> to vector<8x1x32xf32>
    %110 = vector.extract_strided_slice %88 {offsets = [0, 11, 0], sizes = [8, 1, 32], strides = [1, 1, 1]} : vector<8x16x32xf32> to vector<8x1x32xf32>
    %111 = arith.maximumf %109, %110 : vector<8x1x32xf32>
    %c1_89 = arith.constant 1 : index
    %c6_90 = arith.constant 6 : index
    %c0_91 = arith.constant 0 : index
    %112 = vector.load %arg9[%c1_89, %c6_90, %c0_91] : memref<10x10x32xf32, #tpu.memory_space<vmem>>, vector<8x1x32xf32>
    tpu.vector_store %arg9[%c1_89, %c6_90, %c0_91], %111 {strides = array<i32>} : memref<10x10x32xf32, #tpu.memory_space<vmem>>, vector<8x1x32xf32>,
    %113 = vector.extract_strided_slice %88 {offsets = [0, 12, 0], sizes = [8, 1, 32], strides = [1, 1, 1]} : vector<8x16x32xf32> to vector<8x1x32xf32>
    %114 = vector.extract_strided_slice %88 {offsets = [0, 13, 0], sizes = [8, 1, 32], strides = [1, 1, 1]} : vector<8x16x32xf32> to vector<8x1x32xf32>
    %115 = arith.maximumf %113, %114 : vector<8x1x32xf32>
    %c1_92 = arith.constant 1 : index
    %c7_93 = arith.constant 7 : index
    %c0_94 = arith.constant 0 : index
    %116 = vector.load %arg9[%c1_92, %c7_93, %c0_94] : memref<10x10x32xf32, #tpu.memory_space<vmem>>, vector<8x1x32xf32>
    tpu.vector_store %arg9[%c1_92, %c7_93, %c0_94], %115 {strides = array<i32>} : memref<10x10x32xf32, #tpu.memory_space<vmem>>, vector<8x1x32xf32>,
    %117 = vector.extract_strided_slice %88 {offsets = [0, 14, 0], sizes = [8, 1, 32], strides = [1, 1, 1]} : vector<8x16x32xf32> to vector<8x1x32xf32>
    %118 = vector.extract_strided_slice %88 {offsets = [0, 15, 0], sizes = [8, 1, 32], strides = [1, 1, 1]} : vector<8x16x32xf32> to vector<8x1x32xf32>
    %119 = arith.maximumf %117, %118 : vector<8x1x32xf32>
    %c1_95 = arith.constant 1 : index
    %c8_96 = arith.constant 8 : index
    %c0_97 = arith.constant 0 : index
    %120 = vector.load %arg9[%c1_95, %c8_96, %c0_97] : memref<10x10x32xf32, #tpu.memory_space<vmem>>, vector<8x1x32xf32>
    tpu.vector_store %arg9[%c1_95, %c8_96, %c0_97], %119 {strides = array<i32>} : memref<10x10x32xf32, #tpu.memory_space<vmem>>, vector<8x1x32xf32>,
    %cst_98 = arith.constant 0.000000e+00 : f32
    %121 = vector.broadcast %cst_98 : f32 to vector<64x64xf32>
    %c0_99 = arith.constant 0 : index
    %c0_100 = arith.constant 0 : index
    %c0_101 = arith.constant 0 : index
    %122 = vector.load %arg9[%c0_99, %c0_100, %c0_101] : memref<10x10x32xf32, #tpu.memory_space<vmem>>, vector<8x8x32xf32>
    %123 = vector.shape_cast %122 : vector<8x8x32xf32> to vector<64x32xf32>
    %124 = arith.truncf %123 : vector<64x32xf32> to vector<64x32xbf16>
    %c0_102 = arith.constant 0 : index
    %c0_103 = arith.constant 0 : index
    %c0_104 = arith.constant 0 : index
    %125 = vector.load %arg4[%c0_102, %c0_103, %c0_104] : memref<9x32x64xbf16, #tpu.memory_space<vmem>>, vector<1x32x64xbf16>
    %126 = vector.shape_cast %125 : vector<1x32x64xbf16> to vector<32x64xbf16>
    %cst_105 = arith.constant dense<0.000000e+00> : vector<64x64xf32>
    %127 = tpu.matmul %124, %126, %cst_105 {dimension_numbers = #tpu.dot_dimension_numbers<[1], [0], [0], [1], [0, 0, 1, 1], [], []>} : vector<64x32xbf16>, vector<32x64xbf16>, vector<64x64xf32> -> vector<64x64xf32>
    %128 = arith.addf %121, %127 : vector<64x64xf32>
    %c0_106 = arith.constant 0 : index
    %c1_107 = arith.constant 1 : index
    %c0_108 = arith.constant 0 : index
    %129 = vector.load %arg9[%c0_106, %c1_107, %c0_108] : memref<10x10x32xf32, #tpu.memory_space<vmem>>, vector<8x8x32xf32>
    %130 = vector.shape_cast %129 : vector<8x8x32xf32> to vector<64x32xf32>
    %131 = arith.truncf %130 : vector<64x32xf32> to vector<64x32xbf16>
    %c1_109 = arith.constant 1 : index
    %c0_110 = arith.constant 0 : index
    %c0_111 = arith.constant 0 : index
    %132 = vector.load %arg4[%c1_109, %c0_110, %c0_111] : memref<9x32x64xbf16, #tpu.memory_space<vmem>>, vector<1x32x64xbf16>
    %133 = vector.shape_cast %132 : vector<1x32x64xbf16> to vector<32x64xbf16>
    %cst_112 = arith.constant dense<0.000000e+00> : vector<64x64xf32>
    %134 = tpu.matmul %131, %133, %cst_112 {dimension_numbers = #tpu.dot_dimension_numbers<[1], [0], [0], [1], [0, 0, 1, 1], [], []>} : vector<64x32xbf16>, vector<32x64xbf16>, vector<64x64xf32> -> vector<64x64xf32>
    %135 = arith.addf %128, %134 : vector<64x64xf32>
    %c0_113 = arith.constant 0 : index
    %c2_114 = arith.constant 2 : index
    %c0_115 = arith.constant 0 : index
    %136 = vector.load %arg9[%c0_113, %c2_114, %c0_115] : memref<10x10x32xf32, #tpu.memory_space<vmem>>, vector<8x8x32xf32>
    %137 = vector.shape_cast %136 : vector<8x8x32xf32> to vector<64x32xf32>
    %138 = arith.truncf %137 : vector<64x32xf32> to vector<64x32xbf16>
    %c2_116 = arith.constant 2 : index
    %c0_117 = arith.constant 0 : index
    %c0_118 = arith.constant 0 : index
    %139 = vector.load %arg4[%c2_116, %c0_117, %c0_118] : memref<9x32x64xbf16, #tpu.memory_space<vmem>>, vector<1x32x64xbf16>
    %140 = vector.shape_cast %139 : vector<1x32x64xbf16> to vector<32x64xbf16>
    %cst_119 = arith.constant dense<0.000000e+00> : vector<64x64xf32>
    %141 = tpu.matmul %138, %140, %cst_119 {dimension_numbers = #tpu.dot_dimension_numbers<[1], [0], [0], [1], [0, 0, 1, 1], [], []>} : vector<64x32xbf16>, vector<32x64xbf16>, vector<64x64xf32> -> vector<64x64xf32>
    %142 = arith.addf %135, %141 : vector<64x64xf32>
    %c1_120 = arith.constant 1 : index
    %c0_121 = arith.constant 0 : index
    %c0_122 = arith.constant 0 : index
    %143 = vector.load %arg9[%c1_120, %c0_121, %c0_122] : memref<10x10x32xf32, #tpu.memory_space<vmem>>, vector<8x8x32xf32>
    %144 = vector.shape_cast %143 : vector<8x8x32xf32> to vector<64x32xf32>
    %145 = arith.truncf %144 : vector<64x32xf32> to vector<64x32xbf16>
    %c3_123 = arith.constant 3 : index
    %c0_124 = arith.constant 0 : index
    %c0_125 = arith.constant 0 : index
    %146 = vector.load %arg4[%c3_123, %c0_124, %c0_125] : memref<9x32x64xbf16, #tpu.memory_space<vmem>>, vector<1x32x64xbf16>
    %147 = vector.shape_cast %146 : vector<1x32x64xbf16> to vector<32x64xbf16>
    %cst_126 = arith.constant dense<0.000000e+00> : vector<64x64xf32>
    %148 = tpu.matmul %145, %147, %cst_126 {dimension_numbers = #tpu.dot_dimension_numbers<[1], [0], [0], [1], [0, 0, 1, 1], [], []>} : vector<64x32xbf16>, vector<32x64xbf16>, vector<64x64xf32> -> vector<64x64xf32>
    %149 = arith.addf %142, %148 : vector<64x64xf32>
    %c1_127 = arith.constant 1 : index
    %c1_128 = arith.constant 1 : index
    %c0_129 = arith.constant 0 : index
    %150 = vector.load %arg9[%c1_127, %c1_128, %c0_129] : memref<10x10x32xf32, #tpu.memory_space<vmem>>, vector<8x8x32xf32>
    %151 = vector.shape_cast %150 : vector<8x8x32xf32> to vector<64x32xf32>
    %152 = arith.truncf %151 : vector<64x32xf32> to vector<64x32xbf16>
    %c4_130 = arith.constant 4 : index
    %c0_131 = arith.constant 0 : index
    %c0_132 = arith.constant 0 : index
    %153 = vector.load %arg4[%c4_130, %c0_131, %c0_132] : memref<9x32x64xbf16, #tpu.memory_space<vmem>>, vector<1x32x64xbf16>
    %154 = vector.shape_cast %153 : vector<1x32x64xbf16> to vector<32x64xbf16>
    %cst_133 = arith.constant dense<0.000000e+00> : vector<64x64xf32>
    %155 = tpu.matmul %152, %154, %cst_133 {dimension_numbers = #tpu.dot_dimension_numbers<[1], [0], [0], [1], [0, 0, 1, 1], [], []>} : vector<64x32xbf16>, vector<32x64xbf16>, vector<64x64xf32> -> vector<64x64xf32>
    %156 = arith.addf %149, %155 : vector<64x64xf32>
    %c1_134 = arith.constant 1 : index
    %c2_135 = arith.constant 2 : index
    %c0_136 = arith.constant 0 : index
    %157 = vector.load %arg9[%c1_134, %c2_135, %c0_136] : memref<10x10x32xf32, #tpu.memory_space<vmem>>, vector<8x8x32xf32>
    %158 = vector.shape_cast %157 : vector<8x8x32xf32> to vector<64x32xf32>
    %159 = arith.truncf %158 : vector<64x32xf32> to vector<64x32xbf16>
    %c5_137 = arith.constant 5 : index
    %c0_138 = arith.constant 0 : index
    %c0_139 = arith.constant 0 : index
    %160 = vector.load %arg4[%c5_137, %c0_138, %c0_139] : memref<9x32x64xbf16, #tpu.memory_space<vmem>>, vector<1x32x64xbf16>
    %161 = vector.shape_cast %160 : vector<1x32x64xbf16> to vector<32x64xbf16>
    %cst_140 = arith.constant dense<0.000000e+00> : vector<64x64xf32>
    %162 = tpu.matmul %159, %161, %cst_140 {dimension_numbers = #tpu.dot_dimension_numbers<[1], [0], [0], [1], [0, 0, 1, 1], [], []>} : vector<64x32xbf16>, vector<32x64xbf16>, vector<64x64xf32> -> vector<64x64xf32>
    %163 = arith.addf %156, %162 : vector<64x64xf32>
    %c2_141 = arith.constant 2 : index
    %c0_142 = arith.constant 0 : index
    %c0_143 = arith.constant 0 : index
    %164 = vector.load %arg9[%c2_141, %c0_142, %c0_143] : memref<10x10x32xf32, #tpu.memory_space<vmem>>, vector<8x8x32xf32>
    %165 = vector.shape_cast %164 : vector<8x8x32xf32> to vector<64x32xf32>
    %166 = arith.truncf %165 : vector<64x32xf32> to vector<64x32xbf16>
    %c6_144 = arith.constant 6 : index
    %c0_145 = arith.constant 0 : index
    %c0_146 = arith.constant 0 : index
    %167 = vector.load %arg4[%c6_144, %c0_145, %c0_146] : memref<9x32x64xbf16, #tpu.memory_space<vmem>>, vector<1x32x64xbf16>
    %168 = vector.shape_cast %167 : vector<1x32x64xbf16> to vector<32x64xbf16>
    %cst_147 = arith.constant dense<0.000000e+00> : vector<64x64xf32>
    %169 = tpu.matmul %166, %168, %cst_147 {dimension_numbers = #tpu.dot_dimension_numbers<[1], [0], [0], [1], [0, 0, 1, 1], [], []>} : vector<64x32xbf16>, vector<32x64xbf16>, vector<64x64xf32> -> vector<64x64xf32>
    %170 = arith.addf %163, %169 : vector<64x64xf32>
    %c2_148 = arith.constant 2 : index
    %c1_149 = arith.constant 1 : index
    %c0_150 = arith.constant 0 : index
    %171 = vector.load %arg9[%c2_148, %c1_149, %c0_150] : memref<10x10x32xf32, #tpu.memory_space<vmem>>, vector<8x8x32xf32>
    %172 = vector.shape_cast %171 : vector<8x8x32xf32> to vector<64x32xf32>
    %173 = arith.truncf %172 : vector<64x32xf32> to vector<64x32xbf16>
    %c7_151 = arith.constant 7 : index
    %c0_152 = arith.constant 0 : index
    %c0_153 = arith.constant 0 : index
    %174 = vector.load %arg4[%c7_151, %c0_152, %c0_153] : memref<9x32x64xbf16, #tpu.memory_space<vmem>>, vector<1x32x64xbf16>
    %175 = vector.shape_cast %174 : vector<1x32x64xbf16> to vector<32x64xbf16>
    %cst_154 = arith.constant dense<0.000000e+00> : vector<64x64xf32>
    %176 = tpu.matmul %173, %175, %cst_154 {dimension_numbers = #tpu.dot_dimension_numbers<[1], [0], [0], [1], [0, 0, 1, 1], [], []>} : vector<64x32xbf16>, vector<32x64xbf16>, vector<64x64xf32> -> vector<64x64xf32>
    %177 = arith.addf %170, %176 : vector<64x64xf32>
    %c2_155 = arith.constant 2 : index
    %c2_156 = arith.constant 2 : index
    %c0_157 = arith.constant 0 : index
    %178 = vector.load %arg9[%c2_155, %c2_156, %c0_157] : memref<10x10x32xf32, #tpu.memory_space<vmem>>, vector<8x8x32xf32>
    %179 = vector.shape_cast %178 : vector<8x8x32xf32> to vector<64x32xf32>
    %180 = arith.truncf %179 : vector<64x32xf32> to vector<64x32xbf16>
    %c8_158 = arith.constant 8 : index
    %c0_159 = arith.constant 0 : index
    %c0_160 = arith.constant 0 : index
    %181 = vector.load %arg4[%c8_158, %c0_159, %c0_160] : memref<9x32x64xbf16, #tpu.memory_space<vmem>>, vector<1x32x64xbf16>
    %182 = vector.shape_cast %181 : vector<1x32x64xbf16> to vector<32x64xbf16>
    %cst_161 = arith.constant dense<0.000000e+00> : vector<64x64xf32>
    %183 = tpu.matmul %180, %182, %cst_161 {dimension_numbers = #tpu.dot_dimension_numbers<[1], [0], [0], [1], [0, 0, 1, 1], [], []>} : vector<64x32xbf16>, vector<32x64xbf16>, vector<64x64xf32> -> vector<64x64xf32>
    %184 = arith.addf %177, %183 : vector<64x64xf32>
    %c0_162 = arith.constant 0 : index
    %c0_163 = arith.constant 0 : index
    %185 = vector.load %arg5[%c0_162, %c0_163] : memref<1x64xf32, #tpu.memory_space<vmem>>, vector<1x64xf32>
    %186 = vector.broadcast %185 : vector<1x64xf32> to vector<64x64xf32>
    %187 = arith.addf %184, %186 : vector<64x64xf32>
    %cst_164 = arith.constant 0.000000e+00 : f32
    %188 = vector.broadcast %cst_164 : f32 to vector<64x64xf32>
    %189 = arith.maximumf %187, %188 : vector<64x64xf32>
    %190 = vector.shape_cast %189 : vector<64x64xf32> to vector<8x8x64xf32>
    %191 = vector.shape_cast %190 : vector<8x8x64xf32> to vector<4x2x8x64xf32>
    %192 = vector.extract_strided_slice %191 {offsets = [0, 0, 0, 0], sizes = [4, 1, 8, 64], strides = [1, 1, 1, 1]} : vector<4x2x8x64xf32> to vector<4x1x8x64xf32>
    %193 = vector.shape_cast %192 : vector<4x1x8x64xf32> to vector<4x8x64xf32>
    %194 = vector.extract_strided_slice %191 {offsets = [0, 1, 0, 0], sizes = [4, 1, 8, 64], strides = [1, 1, 1, 1]} : vector<4x2x8x64xf32> to vector<4x1x8x64xf32>
    %195 = vector.shape_cast %194 : vector<4x1x8x64xf32> to vector<4x8x64xf32>
    %196 = arith.maximumf %193, %195 : vector<4x8x64xf32>
    %197 = vector.extract_strided_slice %196 {offsets = [0, 0, 0], sizes = [4, 1, 64], strides = [1, 1, 1]} : vector<4x8x64xf32> to vector<4x1x64xf32>
    %198 = vector.extract_strided_slice %196 {offsets = [0, 1, 0], sizes = [4, 1, 64], strides = [1, 1, 1]} : vector<4x8x64xf32> to vector<4x1x64xf32>
    %199 = arith.maximumf %197, %198 : vector<4x1x64xf32>
    %c1_165 = arith.constant 1 : index
    %c1_166 = arith.constant 1 : index
    %c0_167 = arith.constant 0 : index
    %200 = vector.load %arg10[%c1_165, %c1_166, %c0_167] : memref<6x10x64xf32, #tpu.memory_space<vmem>>, vector<4x1x64xf32>
    tpu.vector_store %arg10[%c1_165, %c1_166, %c0_167], %199 {strides = array<i32>} : memref<6x10x64xf32, #tpu.memory_space<vmem>>, vector<4x1x64xf32>,
    %201 = vector.extract_strided_slice %196 {offsets = [0, 2, 0], sizes = [4, 1, 64], strides = [1, 1, 1]} : vector<4x8x64xf32> to vector<4x1x64xf32>
    %202 = vector.extract_strided_slice %196 {offsets = [0, 3, 0], sizes = [4, 1, 64], strides = [1, 1, 1]} : vector<4x8x64xf32> to vector<4x1x64xf32>
    %203 = arith.maximumf %201, %202 : vector<4x1x64xf32>
    %c1_168 = arith.constant 1 : index
    %c2_169 = arith.constant 2 : index
    %c0_170 = arith.constant 0 : index
    %204 = vector.load %arg10[%c1_168, %c2_169, %c0_170] : memref<6x10x64xf32, #tpu.memory_space<vmem>>, vector<4x1x64xf32>
    tpu.vector_store %arg10[%c1_168, %c2_169, %c0_170], %203 {strides = array<i32>} : memref<6x10x64xf32, #tpu.memory_space<vmem>>, vector<4x1x64xf32>,
    %205 = vector.extract_strided_slice %196 {offsets = [0, 4, 0], sizes = [4, 1, 64], strides = [1, 1, 1]} : vector<4x8x64xf32> to vector<4x1x64xf32>
    %206 = vector.extract_strided_slice %196 {offsets = [0, 5, 0], sizes = [4, 1, 64], strides = [1, 1, 1]} : vector<4x8x64xf32> to vector<4x1x64xf32>
    %207 = arith.maximumf %205, %206 : vector<4x1x64xf32>
    %c1_171 = arith.constant 1 : index
    %c3_172 = arith.constant 3 : index
    %c0_173 = arith.constant 0 : index
    %208 = vector.load %arg10[%c1_171, %c3_172, %c0_173] : memref<6x10x64xf32, #tpu.memory_space<vmem>>, vector<4x1x64xf32>
    tpu.vector_store %arg10[%c1_171, %c3_172, %c0_173], %207 {strides = array<i32>} : memref<6x10x64xf32, #tpu.memory_space<vmem>>, vector<4x1x64xf32>,
    %209 = vector.extract_strided_slice %196 {offsets = [0, 6, 0], sizes = [4, 1, 64], strides = [1, 1, 1]} : vector<4x8x64xf32> to vector<4x1x64xf32>
    %210 = vector.extract_strided_slice %196 {offsets = [0, 7, 0], sizes = [4, 1, 64], strides = [1, 1, 1]} : vector<4x8x64xf32> to vector<4x1x64xf32>
    %211 = arith.maximumf %209, %210 : vector<4x1x64xf32>
    %c1_174 = arith.constant 1 : index
    %c4_175 = arith.constant 4 : index
    %c0_176 = arith.constant 0 : index
    %212 = vector.load %arg10[%c1_174, %c4_175, %c0_176] : memref<6x10x64xf32, #tpu.memory_space<vmem>>, vector<4x1x64xf32>
    tpu.vector_store %arg10[%c1_174, %c4_175, %c0_176], %211 {strides = array<i32>} : memref<6x10x64xf32, #tpu.memory_space<vmem>>, vector<4x1x64xf32>,
    %cst_177 = arith.constant 0.000000e+00 : f32
    %213 = vector.broadcast %cst_177 : f32 to vector<32x128xf32>
    %c0_178 = arith.constant 0 : index
    %c0_179 = arith.constant 0 : index
    %c0_180 = arith.constant 0 : index
    %214 = vector.load %arg10[%c0_178, %c0_179, %c0_180] : memref<6x10x64xf32, #tpu.memory_space<vmem>>, vector<4x8x64xf32>
    %215 = vector.shape_cast %214 : vector<4x8x64xf32> to vector<32x64xf32>
    %216 = arith.truncf %215 : vector<32x64xf32> to vector<32x64xbf16>
    %c0_181 = arith.constant 0 : index
    %c0_182 = arith.constant 0 : index
    %c0_183 = arith.constant 0 : index
    %217 = vector.load %arg6[%c0_181, %c0_182, %c0_183] : memref<9x64x128xbf16, #tpu.memory_space<vmem>>, vector<1x64x128xbf16>
    %218 = vector.shape_cast %217 : vector<1x64x128xbf16> to vector<64x128xbf16>
    %cst_184 = arith.constant dense<0.000000e+00> : vector<32x128xf32>
    %219 = tpu.matmul %216, %218, %cst_184 {dimension_numbers = #tpu.dot_dimension_numbers<[1], [0], [0], [1], [0, 0, 1, 1], [], []>} : vector<32x64xbf16>, vector<64x128xbf16>, vector<32x128xf32> -> vector<32x128xf32>
    %220 = arith.addf %213, %219 : vector<32x128xf32>
    %c0_185 = arith.constant 0 : index
    %c1_186 = arith.constant 1 : index
    %c0_187 = arith.constant 0 : index
    %221 = vector.load %arg10[%c0_185, %c1_186, %c0_187] : memref<6x10x64xf32, #tpu.memory_space<vmem>>, vector<4x8x64xf32>
    %222 = vector.shape_cast %221 : vector<4x8x64xf32> to vector<32x64xf32>
    %223 = arith.truncf %222 : vector<32x64xf32> to vector<32x64xbf16>
    %c1_188 = arith.constant 1 : index
    %c0_189 = arith.constant 0 : index
    %c0_190 = arith.constant 0 : index
    %224 = vector.load %arg6[%c1_188, %c0_189, %c0_190] : memref<9x64x128xbf16, #tpu.memory_space<vmem>>, vector<1x64x128xbf16>
    %225 = vector.shape_cast %224 : vector<1x64x128xbf16> to vector<64x128xbf16>
    %cst_191 = arith.constant dense<0.000000e+00> : vector<32x128xf32>
    %226 = tpu.matmul %223, %225, %cst_191 {dimension_numbers = #tpu.dot_dimension_numbers<[1], [0], [0], [1], [0, 0, 1, 1], [], []>} : vector<32x64xbf16>, vector<64x128xbf16>, vector<32x128xf32> -> vector<32x128xf32>
    %227 = arith.addf %220, %226 : vector<32x128xf32>
    %c0_192 = arith.constant 0 : index
    %c2_193 = arith.constant 2 : index
    %c0_194 = arith.constant 0 : index
    %228 = vector.load %arg10[%c0_192, %c2_193, %c0_194] : memref<6x10x64xf32, #tpu.memory_space<vmem>>, vector<4x8x64xf32>
    %229 = vector.shape_cast %228 : vector<4x8x64xf32> to vector<32x64xf32>
    %230 = arith.truncf %229 : vector<32x64xf32> to vector<32x64xbf16>
    %c2_195 = arith.constant 2 : index
    %c0_196 = arith.constant 0 : index
    %c0_197 = arith.constant 0 : index
    %231 = vector.load %arg6[%c2_195, %c0_196, %c0_197] : memref<9x64x128xbf16, #tpu.memory_space<vmem>>, vector<1x64x128xbf16>
    %232 = vector.shape_cast %231 : vector<1x64x128xbf16> to vector<64x128xbf16>
    %cst_198 = arith.constant dense<0.000000e+00> : vector<32x128xf32>
    %233 = tpu.matmul %230, %232, %cst_198 {dimension_numbers = #tpu.dot_dimension_numbers<[1], [0], [0], [1], [0, 0, 1, 1], [], []>} : vector<32x64xbf16>, vector<64x128xbf16>, vector<32x128xf32> -> vector<32x128xf32>
    %234 = arith.addf %227, %233 : vector<32x128xf32>
    %c1_199 = arith.constant 1 : index
    %c0_200 = arith.constant 0 : index
    %c0_201 = arith.constant 0 : index
    %235 = vector.load %arg10[%c1_199, %c0_200, %c0_201] : memref<6x10x64xf32, #tpu.memory_space<vmem>>, vector<4x8x64xf32>
    %236 = vector.shape_cast %235 : vector<4x8x64xf32> to vector<32x64xf32>
    %237 = arith.truncf %236 : vector<32x64xf32> to vector<32x64xbf16>
    %c3_202 = arith.constant 3 : index
    %c0_203 = arith.constant 0 : index
    %c0_204 = arith.constant 0 : index
    %238 = vector.load %arg6[%c3_202, %c0_203, %c0_204] : memref<9x64x128xbf16, #tpu.memory_space<vmem>>, vector<1x64x128xbf16>
    %239 = vector.shape_cast %238 : vector<1x64x128xbf16> to vector<64x128xbf16>
    %cst_205 = arith.constant dense<0.000000e+00> : vector<32x128xf32>
    %240 = tpu.matmul %237, %239, %cst_205 {dimension_numbers = #tpu.dot_dimension_numbers<[1], [0], [0], [1], [0, 0, 1, 1], [], []>} : vector<32x64xbf16>, vector<64x128xbf16>, vector<32x128xf32> -> vector<32x128xf32>
    %241 = arith.addf %234, %240 : vector<32x128xf32>
    %c1_206 = arith.constant 1 : index
    %c1_207 = arith.constant 1 : index
    %c0_208 = arith.constant 0 : index
    %242 = vector.load %arg10[%c1_206, %c1_207, %c0_208] : memref<6x10x64xf32, #tpu.memory_space<vmem>>, vector<4x8x64xf32>
    %243 = vector.shape_cast %242 : vector<4x8x64xf32> to vector<32x64xf32>
    %244 = arith.truncf %243 : vector<32x64xf32> to vector<32x64xbf16>
    %c4_209 = arith.constant 4 : index
    %c0_210 = arith.constant 0 : index
    %c0_211 = arith.constant 0 : index
    %245 = vector.load %arg6[%c4_209, %c0_210, %c0_211] : memref<9x64x128xbf16, #tpu.memory_space<vmem>>, vector<1x64x128xbf16>
    %246 = vector.shape_cast %245 : vector<1x64x128xbf16> to vector<64x128xbf16>
    %cst_212 = arith.constant dense<0.000000e+00> : vector<32x128xf32>
    %247 = tpu.matmul %244, %246, %cst_212 {dimension_numbers = #tpu.dot_dimension_numbers<[1], [0], [0], [1], [0, 0, 1, 1], [], []>} : vector<32x64xbf16>, vector<64x128xbf16>, vector<32x128xf32> -> vector<32x128xf32>
    %248 = arith.addf %241, %247 : vector<32x128xf32>
    %c1_213 = arith.constant 1 : index
    %c2_214 = arith.constant 2 : index
    %c0_215 = arith.constant 0 : index
    %249 = vector.load %arg10[%c1_213, %c2_214, %c0_215] : memref<6x10x64xf32, #tpu.memory_space<vmem>>, vector<4x8x64xf32>
    %250 = vector.shape_cast %249 : vector<4x8x64xf32> to vector<32x64xf32>
    %251 = arith.truncf %250 : vector<32x64xf32> to vector<32x64xbf16>
    %c5_216 = arith.constant 5 : index
    %c0_217 = arith.constant 0 : index
    %c0_218 = arith.constant 0 : index
    %252 = vector.load %arg6[%c5_216, %c0_217, %c0_218] : memref<9x64x128xbf16, #tpu.memory_space<vmem>>, vector<1x64x128xbf16>
    %253 = vector.shape_cast %252 : vector<1x64x128xbf16> to vector<64x128xbf16>
    %cst_219 = arith.constant dense<0.000000e+00> : vector<32x128xf32>
    %254 = tpu.matmul %251, %253, %cst_219 {dimension_numbers = #tpu.dot_dimension_numbers<[1], [0], [0], [1], [0, 0, 1, 1], [], []>} : vector<32x64xbf16>, vector<64x128xbf16>, vector<32x128xf32> -> vector<32x128xf32>
    %255 = arith.addf %248, %254 : vector<32x128xf32>
    %c2_220 = arith.constant 2 : index
    %c0_221 = arith.constant 0 : index
    %c0_222 = arith.constant 0 : index
    %256 = vector.load %arg10[%c2_220, %c0_221, %c0_222] : memref<6x10x64xf32, #tpu.memory_space<vmem>>, vector<4x8x64xf32>
    %257 = vector.shape_cast %256 : vector<4x8x64xf32> to vector<32x64xf32>
    %258 = arith.truncf %257 : vector<32x64xf32> to vector<32x64xbf16>
    %c6_223 = arith.constant 6 : index
    %c0_224 = arith.constant 0 : index
    %c0_225 = arith.constant 0 : index
    %259 = vector.load %arg6[%c6_223, %c0_224, %c0_225] : memref<9x64x128xbf16, #tpu.memory_space<vmem>>, vector<1x64x128xbf16>
    %260 = vector.shape_cast %259 : vector<1x64x128xbf16> to vector<64x128xbf16>
    %cst_226 = arith.constant dense<0.000000e+00> : vector<32x128xf32>
    %261 = tpu.matmul %258, %260, %cst_226 {dimension_numbers = #tpu.dot_dimension_numbers<[1], [0], [0], [1], [0, 0, 1, 1], [], []>} : vector<32x64xbf16>, vector<64x128xbf16>, vector<32x128xf32> -> vector<32x128xf32>
    %262 = arith.addf %255, %261 : vector<32x128xf32>
    %c2_227 = arith.constant 2 : index
    %c1_228 = arith.constant 1 : index
    %c0_229 = arith.constant 0 : index
    %263 = vector.load %arg10[%c2_227, %c1_228, %c0_229] : memref<6x10x64xf32, #tpu.memory_space<vmem>>, vector<4x8x64xf32>
    %264 = vector.shape_cast %263 : vector<4x8x64xf32> to vector<32x64xf32>
    %265 = arith.truncf %264 : vector<32x64xf32> to vector<32x64xbf16>
    %c7_230 = arith.constant 7 : index
    %c0_231 = arith.constant 0 : index
    %c0_232 = arith.constant 0 : index
    %266 = vector.load %arg6[%c7_230, %c0_231, %c0_232] : memref<9x64x128xbf16, #tpu.memory_space<vmem>>, vector<1x64x128xbf16>
    %267 = vector.shape_cast %266 : vector<1x64x128xbf16> to vector<64x128xbf16>
    %cst_233 = arith.constant dense<0.000000e+00> : vector<32x128xf32>
    %268 = tpu.matmul %265, %267, %cst_233 {dimension_numbers = #tpu.dot_dimension_numbers<[1], [0], [0], [1], [0, 0, 1, 1], [], []>} : vector<32x64xbf16>, vector<64x128xbf16>, vector<32x128xf32> -> vector<32x128xf32>
    %269 = arith.addf %262, %268 : vector<32x128xf32>
    %c2_234 = arith.constant 2 : index
    %c2_235 = arith.constant 2 : index
    %c0_236 = arith.constant 0 : index
    %270 = vector.load %arg10[%c2_234, %c2_235, %c0_236] : memref<6x10x64xf32, #tpu.memory_space<vmem>>, vector<4x8x64xf32>
    %271 = vector.shape_cast %270 : vector<4x8x64xf32> to vector<32x64xf32>
    %272 = arith.truncf %271 : vector<32x64xf32> to vector<32x64xbf16>
    %c8_237 = arith.constant 8 : index
    %c0_238 = arith.constant 0 : index
    %c0_239 = arith.constant 0 : index
    %273 = vector.load %arg6[%c8_237, %c0_238, %c0_239] : memref<9x64x128xbf16, #tpu.memory_space<vmem>>, vector<1x64x128xbf16>
    %274 = vector.shape_cast %273 : vector<1x64x128xbf16> to vector<64x128xbf16>
    %cst_240 = arith.constant dense<0.000000e+00> : vector<32x128xf32>
    %275 = tpu.matmul %272, %274, %cst_240 {dimension_numbers = #tpu.dot_dimension_numbers<[1], [0], [0], [1], [0, 0, 1, 1], [], []>} : vector<32x64xbf16>, vector<64x128xbf16>, vector<32x128xf32> -> vector<32x128xf32>
    %276 = arith.addf %269, %275 : vector<32x128xf32>
    %c0_241 = arith.constant 0 : index
    %c0_242 = arith.constant 0 : index
    %277 = vector.load %arg7[%c0_241, %c0_242] : memref<1x128xf32, #tpu.memory_space<vmem>>, vector<1x128xf32>
    %278 = vector.broadcast %277 : vector<1x128xf32> to vector<32x128xf32>
    %279 = arith.addf %276, %278 : vector<32x128xf32>
    %cst_243 = arith.constant 0.000000e+00 : f32
    %280 = vector.broadcast %cst_243 : f32 to vector<32x128xf32>
    %281 = arith.maximumf %279, %280 : vector<32x128xf32>
    %282 = vector.shape_cast %281 : vector<32x128xf32> to vector<4x8x128xf32>
    %283 = vector.shape_cast %282 : vector<4x8x128xf32> to vector<2x2x8x128xf32>
    %284 = vector.extract_strided_slice %283 {offsets = [0, 0, 0, 0], sizes = [2, 1, 8, 128], strides = [1, 1, 1, 1]} : vector<2x2x8x128xf32> to vector<2x1x8x128xf32>
    %285 = vector.shape_cast %284 : vector<2x1x8x128xf32> to vector<2x8x128xf32>
    %286 = vector.extract_strided_slice %283 {offsets = [0, 1, 0, 0], sizes = [2, 1, 8, 128], strides = [1, 1, 1, 1]} : vector<2x2x8x128xf32> to vector<2x1x8x128xf32>
    %287 = vector.shape_cast %286 : vector<2x1x8x128xf32> to vector<2x8x128xf32>
    %288 = arith.maximumf %285, %287 : vector<2x8x128xf32>
    %289 = vector.extract_strided_slice %288 {offsets = [0, 0, 0], sizes = [2, 1, 128], strides = [1, 1, 1]} : vector<2x8x128xf32> to vector<2x1x128xf32>
    %290 = vector.extract_strided_slice %288 {offsets = [0, 1, 0], sizes = [2, 1, 128], strides = [1, 1, 1]} : vector<2x8x128xf32> to vector<2x1x128xf32>
    %291 = arith.maximumf %289, %290 : vector<2x1x128xf32>
    %c0_244 = arith.constant 0 : index
    %c0_245 = arith.constant 0 : index
    %c0_246 = arith.constant 0 : index
    %c0_247 = arith.constant 0 : index
    %292 = vector.load %arg8[%c0_244, %c0_245, %c0_246, %c0_247] : memref<1x2x2x128xf32, #tpu.memory_space<vmem>>, vector<1x2x1x128xf32>
    %293 = vector.shape_cast %292 : vector<1x2x1x128xf32> to vector<2x1x128xf32>
    %294 = vector.shape_cast %291 : vector<2x1x128xf32> to vector<1x2x1x128xf32>
    tpu.vector_store %arg8[%c0_244, %c0_245, %c0_246, %c0_247], %294 {strides = array<i32>} : memref<1x2x2x128xf32, #tpu.memory_space<vmem>>, vector<1x2x1x128xf32>,
    %295 = vector.extract_strided_slice %288 {offsets = [0, 2, 0], sizes = [2, 1, 128], strides = [1, 1, 1]} : vector<2x8x128xf32> to vector<2x1x128xf32>
    %296 = vector.extract_strided_slice %288 {offsets = [0, 3, 0], sizes = [2, 1, 128], strides = [1, 1, 1]} : vector<2x8x128xf32> to vector<2x1x128xf32>
    %297 = arith.maximumf %295, %296 : vector<2x1x128xf32>
    %c0_248 = arith.constant 0 : index
    %c0_249 = arith.constant 0 : index
    %c1_250 = arith.constant 1 : index
    %c0_251 = arith.constant 0 : index
    %298 = vector.load %arg8[%c0_248, %c0_249, %c1_250, %c0_251] : memref<1x2x2x128xf32, #tpu.memory_space<vmem>>, vector<1x2x1x128xf32>
    %299 = vector.shape_cast %298 : vector<1x2x1x128xf32> to vector<2x1x128xf32>
    %300 = vector.shape_cast %297 : vector<2x1x128xf32> to vector<1x2x1x128xf32>
    tpu.vector_store %arg8[%c0_248, %c0_249, %c1_250, %c0_251], %300 {strides = array<i32>} : memref<1x2x2x128xf32, #tpu.memory_space<vmem>>, vector<1x2x1x128xf32>,
    return
  }
  func.func @transform_0(%arg0: i32) -> (i32, i32, i32, i32) {
    %c0_i32 = arith.constant 0 : i32
    %c0_i32_0 = arith.constant 0 : i32
    %c0_i32_1 = arith.constant 0 : i32
    %c0_i32_2 = arith.constant 0 : i32
    return %arg0, %c0_i32, %c0_i32_0, %c0_i32_1 : i32, i32, i32, i32
  }
  func.func @transform_1(%arg0: i32) -> (i32, i32, i32) {
    %c0_i32 = arith.constant 0 : i32
    %c0_i32_0 = arith.constant 0 : i32
    %c0_i32_1 = arith.constant 0 : i32
    %c0_i32_2 = arith.constant 0 : i32
    return %c0_i32, %c0_i32_0, %c0_i32_1 : i32, i32, i32
  }
  func.func @transform_2(%arg0: i32) -> (i32, i32) {
    %c0_i32 = arith.constant 0 : i32
    %c0_i32_0 = arith.constant 0 : i32
    %c0_i32_1 = arith.constant 0 : i32
    return %c0_i32, %c0_i32_0 : i32, i32
  }
  func.func @transform_3(%arg0: i32) -> (i32, i32, i32) {
    %c0_i32 = arith.constant 0 : i32
    %c0_i32_0 = arith.constant 0 : i32
    %c0_i32_1 = arith.constant 0 : i32
    %c0_i32_2 = arith.constant 0 : i32
    return %c0_i32, %c0_i32_0, %c0_i32_1 : i32, i32, i32
  }
  func.func @transform_4(%arg0: i32) -> (i32, i32) {
    %c0_i32 = arith.constant 0 : i32
    %c0_i32_0 = arith.constant 0 : i32
    %c0_i32_1 = arith.constant 0 : i32
    return %c0_i32, %c0_i32_0 : i32, i32
  }
  func.func @transform_5(%arg0: i32) -> (i32, i32, i32) {
    %c0_i32 = arith.constant 0 : i32
    %c0_i32_0 = arith.constant 0 : i32
    %c0_i32_1 = arith.constant 0 : i32
    %c0_i32_2 = arith.constant 0 : i32
    return %c0_i32, %c0_i32_0, %c0_i32_1 : i32, i32, i32
  }
  func.func @transform_6(%arg0: i32) -> (i32, i32) {
    %c0_i32 = arith.constant 0 : i32
    %c0_i32_0 = arith.constant 0 : i32
    %c0_i32_1 = arith.constant 0 : i32
    return %c0_i32, %c0_i32_0 : i32, i32
  }
  func.func @transform_7(%arg0: i32) -> (i32, i32, i32, i32) {
    %c0_i32 = arith.constant 0 : i32
    %c0_i32_0 = arith.constant 0 : i32
    %c0_i32_1 = arith.constant 0 : i32
    %c0_i32_2 = arith.constant 0 : i32
    return %arg0, %c0_i32, %c0_i32_0, %c0_i32_1 : i32, i32, i32, i32
  }
}

</mosaic_0001>

<bundles_post_ra>
// kernel: cnn_feature_extractor.1
= control target key start
LH: loop header
LB: loop body
LE: loop exit
PB: predicated region body
PF: predicated region fallthrough
CT: control target
= control target key end

     0   :  { %12 = vsyncpa [#allocation5], 0  ;;  %s8332_s0 = inlined_call_operand.vmem [shape: f32[2,18,18,8], index: 0, kind: input, shape index: {}]   ;;  %s8333_s1 = inlined_call_operand.vmem [shape: bf16[9,8,32], index: 1, kind: input, shape index: {}]   ;;  %s8334_s2 = inlined_call_operand.vmem [shape: f32[1,32], index: 2, kind: input, shape index: {}]   ;;  %s8335_s3 = inlined_call_operand.vmem [shape: bf16[9,32,64], index: 3, kind: input, shape index: {}]   ;;  %s8336_s4 = inlined_call_operand.vmem [shape: f32[1,64], index: 4, kind: input, shape index: {}]   ;;  %s8337_s5 = inlined_call_operand.vmem [shape: bf16[9,64,128], index: 5, kind: input, shape index: {}]   ;;  %s8338_s6 = inlined_call_operand.vmem [shape: f32[1,128], index: 6, kind: input, shape index: {}]   ;;  %s8339_s7 = inlined_call_operand.hbm [shape: f32[2,2,2,128], index: 7, kind: output, shape index: {}]  }
   0x1   :  { %14 = vsyncpa [#allocation5 + $0x1], 0  ;;  %s7087_s24 = smov 0   ;;  %s7089_s25 = smov 0  }
   0x2   :  { %s7091_s26 = smov 0   ;;  %s7093_s27 = smov 0  }
   0x3 LB: > { %s7108_s28 = sadd.s32 4294967295, %s7041_s27   ;;  %s5172_s29 = sadd.s32 4294967294, %s7041_s27   ;;  %s7041_s27 = sphi %s7093_s27, %s8345_s27   ;;  %s7037_s26 = sphi %s7091_s26, %s8344_s26   ;;  %s7033_s25 = sphi %s7089_s25, %s8343_s25   ;;  %s7029_s24 = sphi %s7087_s24, %s8342_s24  }
   0x4   : > { %s7112_s30 = sadd.s32 1, %s7041_s27   ;;  %s179_s8 = sadd.s32 1, %s7037_s26 }
   0x5   : > { %s176_s9 = ssub.s32 %s7041_s27, %s7112_s30  ;;  %p189_p0 = scmp.ne.s32.totalorder %s7037_s26, %s7033_s25 }
   0x6   : > { %p177_p1 = scmp.eq.s32.totalorder %s176_s9, 0  ;;  %p190_p2 = scmp.eq.s32.totalorder %s7108_s28, 1 }
   0x7   : > { %p195_p3 = scmp.ne.s32.totalorder %s7033_s25, %s7029_s24  ;;  %p196_p4 = scmp.eq.s32.totalorder %s5172_s29, 1 }
   0x8   : > { %s7123_s10 = scalar_select %p177_p1, %s7037_s26, %s179_s8  }
   0x9   : > { %p7125_p5 = por %p190_p2, %p189_p0  ;;  %p7129_p6 = por %p196_p4, %p195_p3 }
   0xa   : > { %p5175_p7 = scmp.ge.s32.totalorder %s7041_s27, 1  ;;  %p240_p8 = scmp.lt.s32.totalorder %s7041_s27, 3 }
   0xc   : > { %p241_p9 = pnand %p5175_p7, %p240_p8 }
   0xd   : > { %vm462_vm0 = vcmask (!%p241_p9), 1043456   ;;  %v7138_v0 = vld [vmem:[%s8333_s1 + $0x8] sm:$0xf] (!%p241_p9)  ;;  %p272_p10 = scmp.lt.s32.totalorder (!%p241_p9), %s7108_s28, 1  ;;  %v5260_v2 = vld [vmem:[%s8333_s1 + $0xc] sm:$0xf] (!%p241_p9) }
   0xe   : > { %244 = sbr.rel (%p241_p9) target bundleno = 1420 (0x58c), region = 48  ;;  %6874 = vmatprep.subr.msk.bf16.mxu0 (!%p241_p9), %vm462_vm0, %v7138_v0  ;;  %v7145_v1 = vsel (!%p241_p9), %vm462_vm0, %v7138_v0, 0  ;;  %vm413_vm1 = vcmask (!%p241_p9), 64512   ;;  %v1233_v11 = vsel (!%p241_p9), %vm462_vm0, %v5260_v2, 0  ;;  %v5309_v13 = vld [vmem:[%s8333_s1 + $0x10] sm:$0xf] (!%p241_p9) }
   0xf   : > { %6065 = vmatpush3.bf16.msra.mxu0 (!%p241_p9), %v7145_v1  ;;  %v1527_v47 = vsel (!%p241_p9), %vm462_vm0, %v5309_v13, 0  ;;  %v7250_v51 = vld [vmem:[%s8333_s1 + $0x14] sm:$0xf] (!%p241_p9)  ;;  %vm278_vm2 = vcmask (!%p241_p9), 261120   ;;  %vm280_vm3 = vcmask (!%p241_p9), 254976   ;;  %vm3019_vm4 = vcmask (!%p241_p9), 253952  }
  0x10   : > { %6876 = vmatprep.subr.msk.bf16.mxu0 (!%p241_p9), %vm462_vm0, %v5260_v2  ;;  %vm3028_vm5 = vcmask (!%p241_p9), 256002   ;;  %vm3037_vm6 = vcmask (!%p241_p9), 258052   ;;  %vm3046_vm7 = vcmask (!%p241_p9), 260102   ;;  %vm300_vm8 = vcmask (!%p241_p9), 523264   ;;  %s269_s29 = sand.u32 (!%p241_p9), 1, %s7033_s25   ;;  %s5734_s14 = sshll.u32 (!%p241_p9), %s7108_s28, 6 }
  0x11   : > { %vm302_vm9 = vcmask (!%p241_p9), 517120   ;;  %vm4173_vm10 = vcmask (!%p241_p9), 516096   ;;  %vm4178_vm11 = vcmask (!%p241_p9), 518146   ;;  %vm4183_vm12 = vcmask (!%p241_p9), 520196   ;;  %s5176_s8 = sshll.u32 (!%p241_p9), %s269_s29, 2  ;;  %s7044_s19 = smov (!%p241_p9), [#allocation4]  }
  0x12   : > { %vm4188_vm13 = vcmask (!%p241_p9), 522246   ;;  %s271_s9 = scalar_lea.vmem (!%p241_p9), [#allocation4], %s5176_s8  ;;  %s6983_s20 = sshll.u32 (!%p241_p9), %s7044_s19, 4  ;;  %s6984_s20 = int_to_ptr.vmem [resolvable:$false] %s6983_s20 }
  0x13   : > { %s5110_s13 = sshll.u32 (!%p241_p9), %s271_s9, 4  ;;  %s6985_s22 = scalar_lea.vmem (!%p241_p9), %s6984_s20, 128  ;;  %s8289_s13 = int_to_ptr.vmem [resolvable:$true] %s5110_s13 }
  0x14   : > { %p6986_p0 = scmp.lt.s32.totalorder (!%p241_p9), %s8289_s13, %s6984_s20 }
  0x15   : > { %s273_s17 = scalar_select %p272_p10, %s7108_s28, 1 }
  0x16   : > { %s6979_s28 = scalar_lea.vmem %s8289_s13, 64 }
  0x17   : > { %s6882_s18 = smul.u32 432, %s273_s17  ;;  %s8287_s17 = scalar_lea.hbm %s8339_s7, %s5734_s14 }
  0x18   : > { %p6980_p11 = scmp.ne.s32.totalorder %s8289_s13, %s6979_s28  ;;  %p6987_p1 = scmp.lt.s32.totalorder %s6985_s22, %s6979_s28 }
  0x19   : > { %s7156_s21 = scalar_lea.vmem %s8332_s0, %s6882_s18  ;;  %s8291_s18 = scalar_lea.sflag [#allocation5], %s269_s29 }
  0x1a   : > { %v839_v3 = vld [vmem:[%s7156_s21 + $0x2] sm:$0xff]  ;;  %v840_v4 = vld [vmem:[%s7156_s21 + $0xa] sm:$0xff]  ;;  %v841_v5 = vld [vmem:[%s7156_s21 + $0x1a] sm:$0xff]  ;;  %p6981_p12 = pnand %p6980_p11, %p7125_p5  ;;  %p6988_p2 = por %p6987_p1, %p6986_p0 }
  0x1b   : > { %v871_v6 = vpack.c.bf16 %v840_v4, %v839_v3  ;;  %v842_v7 = vld [vmem:[%s7156_s21 + $0x22] sm:$0xff]  ;;  %v843_v8 = vld [vmem:[%s7156_s21 + $0x32] sm:$0xff]  ;;  %v844_v9 = vld [vmem:[%s7156_s21 + $0x3a] sm:$0xff] }
  0x1c   : > { %v7164_v10 = vpack.c.bf16 %v842_v7, %v841_v5  ;;  %v7167_v12 = vpack.c.bf16 %v844_v9, %v843_v8  ;;  %v845_v14 = vld [vmem:[%s7156_s21 + $0x4a] sm:$0xff]  ;;  %v846_v15 = vld [vmem:[%s7156_s21 + $0x52] sm:$0xff]  ;;  %v847_v16 = vld [vmem:[%s7156_s21 + $0x62] sm:$0xff]  ;;  %p6982_p13 = pneg %p6981_p12 }
  0x1d   : > { %6066 = vmatprep.mubr.msk.bf16.mxu0 %vm413_vm1, %v871_v6  ;;  %v848_v17 = vld [vmem:[%s7156_s21 + $0x6a] sm:$0xff]  ;;  %v7182_v18 = vpack.c.bf16 %v846_v15, %v845_v14  ;;  %v849_v20 = vld [vmem:[%s7156_s21 + $0x7a] sm:$0xff]  ;;  %v850_v21 = vld [vmem:[%s7156_s21 + $0x82] sm:$0xff] }
  0x1e   : > { %6067 = vmatmul.mubr.msk.bf16.vlgmr.msra.gmra.mrb[0].mxu0 %vm413_vm1, %v7164_v10  ;;  %v7184_v19 = vpack.c.bf16 %v848_v17, %v847_v16  ;;  %v851_v22 = vld [vmem:[%s7156_s21 + $0x92] sm:$0xff]  ;;  %v852_v23 = vld [vmem:[%s7156_s21 + $0x9a] sm:$0xff]  ;;  %v7194_v24 = vpack.c.bf16 %v850_v21, %v849_v20  ;;  %v853_v26 = vld [vmem:[%s7156_s21 + $0xaa] sm:$0xff]  ;;  %p6989_p3 = pnand %p6988_p2, %p6982_p13 }
  0x1f   : > { %6099 = vmatpush3.bf16.msra.mxu0 %v1233_v11  ;;  %6070 = vmatprep.mubr.msk.bf16.mxu0 %vm413_vm1, %v7167_v12  ;;  %v7196_v25 = vpack.c.bf16 %v852_v23, %v851_v22  ;;  %v854_v27 = vld [vmem:[%s7156_s21 + $0xb2] sm:$0xff]  ;;  %v855_v28 = vld [vmem:[%s7156_s21 + $0xc2] sm:$0xff]  ;;  %v856_v29 = vld [vmem:[%s7156_s21 + $0xca] sm:$0xff] }
  0x20   : > { %6877 = vmatprep.subr.msk.bf16.mxu0 %vm462_vm0, %v5309_v13  ;;  %v7206_v30 = vpack.c.bf16 %v854_v27, %v853_v26  ;;  %v7208_v31 = vpack.c.bf16 %v856_v29, %v855_v28  ;;  %v857_v32 = vld [vmem:[%s7156_s21 + $0xda] sm:$0xff]  ;;  %v858_v33 = vld [vmem:[%s7156_s21 + $0xe2] sm:$0xff]  ;;  %v859_v34 = vld [vmem:[%s7156_s21 + $0xf2] sm:$0xff] }
  0x21   : > { %v860_v35 = vld [vmem:[%s7156_s21 + $0xfa] sm:$0xff]  ;;  %v7218_v36 = vpack.c.bf16 %v858_v33, %v857_v32  ;;  %v861_v38 = vld [vmem:[%s7156_s21 + $0x10a] sm:$0xff]  ;;  %v862_v39 = vld [vmem:[%s7156_s21 + $0x112] sm:$0xff] }
  0x22   : > { %v7220_v37 = vpack.c.bf16 %v860_v35, %v859_v34  ;;  %v5228_v40 = vld [vmem:[%s7156_s21 + $0x18] sm:$0xff]  ;;  %v5229_v41 = vld [vmem:[%s7156_s21 + $0x20] sm:$0xff]  ;;  %v7230_v42 = vpack.c.bf16 %v862_v39, %v861_v38  ;;  %v5230_v44 = vld [vmem:[%s7156_s21 + $0x30] sm:$0xff] }
  0x23   : > { %v7232_v43 = vpack.c.bf16 %v5229_v41, %v5228_v40  ;;  %v5231_v45 = vld [vmem:[%s7156_s21 + $0x38] sm:$0xff]  ;;  %v5232_v46 = vld [vmem:[%s7156_s21 + $0x48] sm:$0xff]  ;;  %v5233_v48 = vld [vmem:[%s7156_s21 + $0x50] sm:$0xff] }
  0x24   : > { %v7243_v49 = vpack.c.bf16 %v5231_v45, %v5230_v44  ;;  %v7245_v50 = vpack.c.bf16 %v5233_v48, %v5232_v46  ;;  %v5234_v52 = vld [vmem:[%s7156_s21 + $0x60] sm:$0xff]  ;;  %v5235_v53 = vld [vmem:[%s7156_s21 + $0x68] sm:$0xff]  ;;  %v5236_v54 = vld [vmem:[%s7156_s21 + $0x78] sm:$0xff] }
  0x25   : > { %v5237_v55 = vld [vmem:[%s7156_s21 + $0x80] sm:$0xff]  ;;  %v7262_v56 = vpack.c.bf16 %v5235_v53, %v5234_v52  ;;  %v5238_v58 = vld [vmem:[%s7156_s21 + $0x90] sm:$0xff]  ;;  %v5239_v59 = vld [vmem:[%s7156_s21 + $0x98] sm:$0xff] }
  0x26   : > { %6071 = vmatmul.mubr.msk.bf16.gmra.mrb[4].mxu0 %vm413_vm1, %v7182_v18  ;;  %v7264_v57 = vpack.c.bf16 %v5237_v55, %v5236_v54  ;;  %v5240_v60 = vld [vmem:[%s7156_s21 + $0xa8] sm:$0xff]  ;;  %v5241_v61 = vld [vmem:[%s7156_s21 + $0xb0] sm:$0xff]  ;;  %v7274_v62 = vpack.c.bf16 %v5239_v59, %v5238_v58  ;;  %v5242_v2 = vld [vmem:[%s7156_s21 + $0xc0] sm:$0xff] }
  0x27   : > { %6074 = vmatprep.mubr.msk.bf16.mxu0 %vm413_vm1, %v7184_v19  ;;  %v7276_v63 = vpack.c.bf16 %v5241_v61, %v5240_v60  ;;  %v5243_v3 = vld [vmem:[%s7156_s21 + $0xc8] sm:$0xff]  ;;  %v5244_v4 = vld [vmem:[%s7156_s21 + $0xd8] sm:$0xff]  ;;  %v5245_v5 = vld [vmem:[%s7156_s21 + $0xe0] sm:$0xff] }
  0x28   : > { %v7286_v6 = vpack.c.bf16 %v5243_v3, %v5242_v2  ;;  %v7288_v7 = vpack.c.bf16 %v5245_v5, %v5244_v4  ;;  %v5246_v8 = vld [vmem:[%s7156_s21 + $0xf0] sm:$0xff]  ;;  %v5277_v9 = vld [vmem:[%s7156_s21 + $0x19] sm:$0xff]  ;;  %v5278_v11 = vld [vmem:[%s7156_s21 + $0x21] sm:$0xff] }
  0x29   : > { %v5178_v13 = vld [vmem:[%s8333_s1 + $0x4] sm:$0xf]  ;;  %v364_v15 = vld [vmem:[%s7156_s21 + $0x9] sm:$0xff]  ;;  %v5247_v16 = vld [vmem:[%s7156_s21 + $0xf8] sm:$0xff]  ;;  %v1460_v27 = vpack.c.bf16 %v5278_v11, %v5277_v9 }
  0x2a   : > { %v363_v14 = vld [vmem:[%s7156_s21 + $0x1] sm:$0xff]  ;;  %v5279_v17 = vld [vmem:[%s7156_s21 + $0x31] sm:$0xff]  ;;  %v5280_v20 = vld [vmem:[%s7156_s21 + $0x39] sm:$0xff]  ;;  %6872 = vmatprep.subr.msk.bf16.mxu1 %vm462_vm0, %v5178_v13  ;;  %v464_v21 = vsel %vm462_vm0, %v5178_v13, 0  ;;  %v7310_v28 = vpack.c.bf16 %v5247_v16, %v5246_v8 }
  0x2b   : > { %v395_v22 = vpack.c.bf16 %v364_v15, %v363_v14  ;;  %v5248_v23 = vld [vmem:[%s7156_s21 + $0x108] sm:$0xff]  ;;  %v5249_v26 = vld [vmem:[%s7156_s21 + $0x110] sm:$0xff]  ;;  %5997 = vmatpush3.bf16.msra.mxu1 %v464_v21  ;;  %v7312_v29 = vpack.c.bf16 %v5280_v20, %v5279_v17  ;;  %v5250_v33 = vld [vmem:[%s7156_s21 + $0x120] sm:$0xff] }
  0x2c   : > { %v7314_v32 = vpack.c.bf16 %v5249_v26, %v5248_v23  ;;  %v5281_v34 = vld [vmem:[%s7156_s21 + $0x49] sm:$0xff]  ;;  %v5282_v35 = vld [vmem:[%s7156_s21 + $0x51] sm:$0xff]  ;;  %v5283_v39 = vld [vmem:[%s7156_s21 + $0x61] sm:$0xff] }
  0x2d   : > { %5998 = vmatprep.mubr.msk.bf16.mxu1 %vm413_vm1, %v395_v22  ;;  %v5251_v38 = vld [vmem:[%s7156_s21 + $0x128] sm:$0xff]  ;;  %v5252_v41 = vld [vmem:[%s7156_s21 + $0x138] sm:$0xff]  ;;  %v5253_v44 = vld [vmem:[%s7156_s21 + $0x140] sm:$0xff]  ;;  %v7331_v45 = vpack.c.bf16 %v5282_v35, %v5281_v34  ;;  %v1821_v35 = vsel %vm462_vm0, %v7250_v51, 0 }
  0x2e   : > { %6075 = vmatmul.mubr.msk.bf16.gmra.mrb[8].mxu0 %vm413_vm1, %v7194_v24  ;;  %5999 = vmatmul.mubr.msk.bf16.vlgmr.msra.gmra.mrb[0].mxu1 %vm413_vm1, %v1460_v27  ;;  %v5284_v40 = vld [vmem:[%s7156_s21 + $0x69] sm:$0xff]  ;;  %v7333_v46 = vpack.c.bf16 %v5251_v38, %v5250_v33  ;;  %v7337_v48 = vpack.c.bf16 %v5253_v44, %v5252_v41  ;;  %v5285_v53 = vld [vmem:[%s7156_s21 + $0x79] sm:$0xff]  ;;  %v5286_v54 = vld [vmem:[%s7156_s21 + $0x81] sm:$0xff] }
  0x2f   : > { %6078 = vmatprep.mubr.msk.bf16.mxu0 %vm413_vm1, %v7196_v25  ;;  %6002 = vmatprep.mubr.msk.bf16.mxu1 %vm413_vm1, %v7312_v29  ;;  %v5254_v52 = vld [vmem:[%s7156_s21 + $0x150] sm:$0xff]  ;;  %v5255_v55 = vld [vmem:[%s7156_s21 + $0x158] sm:$0xff]  ;;  %v5256_v60 = vld [vmem:[%s7156_s21 + $0x168] sm:$0xff]  ;;  %v7355_v2 = vpack.c.bf16 %v5286_v54, %v5285_v53 }
  0x30   : > { %v5287_v58 = vld [vmem:[%s7156_s21 + $0x91] sm:$0xff]  ;;  %v5288_v59 = vld [vmem:[%s7156_s21 + $0x99] sm:$0xff]  ;;  %v7357_v3 = vpack.c.bf16 %v5255_v55, %v5254_v52  ;;  %v5289_v9 = vld [vmem:[%s7156_s21 + $0xa9] sm:$0xff] }
  0x31   : > { %v5257_v61 = vld [vmem:[%s7156_s21 + $0x170] sm:$0xff]  ;;  %v7359_v4 = vpack.c.bf16 %v5288_v59, %v5287_v58  ;;  %v5258_v8 = vld [vmem:[%s7156_s21 + $0x180] sm:$0xff]  ;;  %v5259_v13 = vld [vmem:[%s7156_s21 + $0x188] sm:$0xff] }
  0x32   : > { %v7361_v5 = vpack.c.bf16 %v5257_v61, %v5256_v60  ;;  %v5290_v11 = vld [vmem:[%s7156_s21 + $0xb1] sm:$0xff]  ;;  %v5291_v14 = vld [vmem:[%s7156_s21 + $0xc1] sm:$0xff]  ;;  %v5292_v15 = vld [vmem:[%s7156_s21 + $0xc9] sm:$0xff]  ;;  %v7379_v17 = vpack.c.bf16 %v5259_v13, %v5258_v8 }
  0x33   : > { %v7377_v16 = vpack.c.bf16 %v5290_v11, %v5289_v9  ;;  %v7381_v20 = vpack.c.bf16 %v5292_v15, %v5291_v14  ;;  %v5293_v21 = vld [vmem:[%s7156_s21 + $0xd9] sm:$0xff]  ;;  %v5294_v22 = vld [vmem:[%s7156_s21 + $0xe1] sm:$0xff]  ;;  %v5295_v23 = vld [vmem:[%s7156_s21 + $0xf1] sm:$0xff] }
  0x34   : > { %v5296_v26 = vld [vmem:[%s7156_s21 + $0xf9] sm:$0xff]  ;;  %v7394_v33 = vpack.c.bf16 %v5294_v22, %v5293_v21  ;;  %v5297_v38 = vld [vmem:[%s7156_s21 + $0x109] sm:$0xff]  ;;  %v5302_v53 = vld [vmem:[%s7156_s21 + $0x141] sm:$0xff] }
  0x35   : > { %v7396_v34 = vpack.c.bf16 %v5296_v26, %v5295_v23  ;;  %v5301_v52 = vld [vmem:[%s7156_s21 + $0x139] sm:$0xff]  ;;  %v5303_v54 = vld [vmem:[%s7156_s21 + $0x151] sm:$0xff]  ;;  %v5305_v60 = vld [vmem:[%s7156_s21 + $0x169] sm:$0xff] }
  0x36   : > { %6079 = vmatmul.mubr.msk.bf16.gmra.mrb[12].mxu0 %vm413_vm1, %v7206_v30  ;;  %6003 = vmatmul.mubr.msk.bf16.gmra.mrb[4].mxu1 %vm413_vm1, %v7331_v45  ;;  %v5304_v55 = vld [vmem:[%s7156_s21 + $0x159] sm:$0xff]  ;;  %v7432_v58 = vpack.c.bf16 %v5302_v53, %v5301_v52  ;;  %v5306_v61 = vld [vmem:[%s7156_s21 + $0x171] sm:$0xff]  ;;  %v315_v13 = vld [vmem:[%s7156_s21 + $0x8] sm:$0xff] }
  0x37   : > { %6082 = vmatprep.mubr.msk.bf16.mxu0 %vm413_vm1, %v7208_v31  ;;  %v7434_v59 = vpack.c.bf16 %v5304_v55, %v5303_v54  ;;  %v7446_v8 = vpack.c.bf16 %v5306_v61, %v5305_v60  ;;  %v362_v9 = vld [vmem:[%s8333_s1] sm:$0xf]  ;;  %v5456_v22 = vld [vmem:[%s8333_s1 + $0x1c] sm:$0xf]  ;;  %v5481_v52 = vld [vmem:[%s7156_s21 + $0x92] sm:$0xff] }
  0x38   : > { %v314_v11 = vld [vmem:[%s7156_s21] sm:$0xff]  ;;  %6873 = vmatprep.subr.msk.bf16.mxu1 %vm462_vm0, %v362_v9  ;;  %v676_v14 = vsel %vm462_vm0, %v362_v9, 0  ;;  %v5483_v61 = vld [vmem:[%s7156_s21 + $0xaa] sm:$0xff] }
  0x39   : > { %v346_v15 = vpack.c.bf16 %v315_v13, %v314_v11  ;;  %6031 = vmatpush3.bf16.msra.mxu1 %v676_v14  ;;  %v5482_v53 = vld [vmem:[%s7156_s21 + $0x9a] sm:$0xff]  ;;  %v5485_v11 = vld [vmem:[%s7156_s21 + $0xc2] sm:$0xff]  ;;  %v5486_v13 = vld [vmem:[%s7156_s21 + $0xca] sm:$0xff] }
  0x3a   : > { %6875 = vmatprep.subr.msk.bf16.mxu1 %vm462_vm0, %v7138_v0  ;;  %v5307_v0 = vld [vmem:[%s7156_s21 + $0x181] sm:$0xff] }
  0x3e   : > { %6083 = vmatmul.mubr.msk.bf16.gmra.mrb[16].mxu0 %vm413_vm1, %v7218_v36 }
  0x3f   : > { %6086 = vmatprep.mubr.msk.bf16.mxu0 %vm413_vm1, %v7220_v37 }
  0x46   : > { %6087 = vmatmul.mubr.msk.bf16.gmra.mrb[20].mxu0 %vm413_vm1, %v7230_v42 }
  0x47   : > { %6100 = vmatprep.mubr.msk.bf16.mxu0 %vm413_vm1, %v7232_v43 }
  0x4e   : > { %6101 = vmatmul.mubr.msk.bf16.vlgmr.msra.gmra.mrb[0].mxu0 %vm413_vm1, %v7243_v49 }
  0x4f   : > { %6133 = vmatpush3.bf16.msra.mxu0 %v1527_v47  ;;  %6104 = vmatprep.mubr.msk.bf16.mxu0 %vm413_vm1, %v7245_v50  ;;  %v7335_v47 = vpack.c.bf16 %v5284_v40, %v5283_v39  ;;  %v5298_v39 = vld [vmem:[%s7156_s21 + $0x111] sm:$0xff]  ;;  %v5300_v40 = vld [vmem:[%s7156_s21 + $0x129] sm:$0xff] }
  0x50   : > { %6878 = vmatprep.subr.msk.bf16.mxu0 %vm462_vm0, %v7250_v51  ;;  %v5299_v51 = vld [vmem:[%s7156_s21 + $0x121] sm:$0xff]  ;;  %v7416_v41 = vpack.c.bf16 %v5298_v39, %v5297_v38  ;;  %v2410_v38 = vsel %vm462_vm0, %v5456_v22, 0 }
  0x51   : > { %6006 = vmatprep.mubr.msk.bf16.mxu1 %vm413_vm1, %v7335_v47  ;;  %v7418_v44 = vpack.c.bf16 %v5300_v40, %v5299_v51  ;;  %v5505_v39 = vld [vmem:[%s8333_s1 + $0x20] sm:$0xf] }
  0x52   : > { %6007 = vmatmul.mubr.msk.bf16.gmra.mrb[8].mxu1 %vm413_vm1, %v7355_v2  ;;  %v5479_v40 = vld [vmem:[%s7156_s21 + $0x7a] sm:$0xff] }
  0x53   : > { %6010 = vmatprep.mubr.msk.bf16.mxu1 %vm413_vm1, %v7359_v4 }
  0x56   : > { %6105 = vmatmul.mubr.msk.bf16.gmra.mrb[4].mxu0 %vm413_vm1, %v7262_v56 }
  0x57   : > { %6108 = vmatprep.mubr.msk.bf16.mxu0 %vm413_vm1, %v7264_v57 }
  0x5a   : > { %6011 = vmatmul.mubr.msk.bf16.gmra.mrb[12].mxu1 %vm413_vm1, %v7377_v16 }
  0x5b   : > { %6014 = vmatprep.mubr.msk.bf16.mxu1 %vm413_vm1, %v7381_v20 }
  0x5e   : > { %6109 = vmatmul.mubr.msk.bf16.gmra.mrb[8].mxu0 %vm413_vm1, %v7274_v62 }
  0x5f   : > { %6112 = vmatprep.mubr.msk.bf16.mxu0 %vm413_vm1, %v7276_v63 }
  0x62   : > { %6015 = vmatmul.mubr.msk.bf16.gmra.mrb[16].mxu1 %vm413_vm1, %v7394_v33 }
  0x63   : > { %6018 = vmatprep.mubr.msk.bf16.mxu1 %vm413_vm1, %v7396_v34 }
  0x66   : > { %6113 = vmatmul.mubr.msk.bf16.gmra.mrb[12].mxu0 %vm413_vm1, %v7286_v6 }
  0x67   : > { %6116 = vmatprep.mubr.msk.bf16.mxu0 %vm413_vm1, %v7288_v7 }
  0x6a   : > { %6019 = vmatmul.mubr.msk.bf16.gmra.mrb[20].mxu1 %vm413_vm1, %v7416_v41 }
  0x6b   : > { %6022 = vmatprep.mubr.msk.bf16.mxu1 %vm413_vm1, %v7418_v44 }
  0x6e   : > { %6117 = vmatmul.mubr.msk.bf16.gmra.mrb[16].mxu0 %vm413_vm1, %v7310_v28 }
  0x6f   : > { %6120 = vmatprep.mubr.msk.bf16.mxu0 %vm413_vm1, %v7314_v32 }
  0x72   : > { %6023 = vmatmul.mubr.msk.bf16.gmra.mrb[24].mxu1 %vm413_vm1, %v7432_v58 }
  0x73   : > { %6026 = vmatprep.mubr.msk.bf16.mxu1 %vm413_vm1, %v7434_v59 }
  0x76   : > { %6121 = vmatmul.mubr.msk.bf16.gmra.mrb[20].mxu0 %vm413_vm1, %v7333_v46 }
  0x77   : > { %6124 = vmatprep.mubr.msk.bf16.mxu0 %vm413_vm1, %v7337_v48 }
  0x7a   : > { %6027 = vmatmul.mubr.msk.bf16.gmra.mrb[28].mxu1 %vm413_vm1, %v7446_v8 }
  0x7b   : > { %6032 = vmatprep.mubr.msk.bf16.mxu1 %vm413_vm1, %v346_v15 }
  0x7e   : > { %6125 = vmatmul.mubr.msk.bf16.gmra.mrb[24].mxu0 %vm413_vm1, %v7357_v3 }
  0x7f   : > { %6128 = vmatprep.mubr.msk.bf16.mxu0 %vm413_vm1, %v7361_v5 }
  0x82   : > { %6033 = vmatmul.mubr.msk.bf16.vlgmr.msra.gmra.mrb[0].mxu1 %vm413_vm1, %v7232_v43 }
  0x83   : > { %6036 = vmatprep.mubr.msk.bf16.mxu1 %vm413_vm1, %v7243_v49  ;;  %6519 = vmatpush3.bf16.msra.mxu1 %v7145_v1  ;;  %v5308_v1 = vld [vmem:[%s7156_s21 + $0x189] sm:$0xff] }
  0x84   : > { %v7491_v43 = vpack.c.bf16 %v5308_v1, %v5307_v0  ;;  %v2643_v1 = vpack.c.bf16 %v5486_v13, %v5485_v11 }
  0x86   : > { %6129 = vmatmul.mubr.msk.bf16.gmra.mrb[28].mxu0 %vm413_vm1, %v7379_v17 }
  0x87   : > { %6134 = vmatprep.mubr.msk.bf16.mxu0 %vm413_vm1, %v1460_v27  ;;  %v5407_v27 = vld [vmem:[%s8333_s1 + $0x18] sm:$0xf] }
  0x88   : > { %v2116_v21 = vsel %vm462_vm0, %v5407_v27, 0 }
  0x8a   : > { %6037 = vmatmul.mubr.msk.bf16.gmra.mrb[4].mxu1 %vm413_vm1, %v7245_v50 }
  0x8b   : > { %6040 = vmatprep.mubr.msk.bf16.mxu1 %vm413_vm1, %v7262_v56 }
  0x8e   : > { %6135 = vmatmul.mubr.msk.bf16.vlgmr.msra.gmra.mrb[0].mxu0 %vm413_vm1, %v7312_v29 }
  0x8f   : > { %6167 = vmatpush3.bf16.msra.mxu0 %v1821_v35  ;;  %6138 = vmatprep.mubr.msk.bf16.mxu0 %vm413_vm1, %v7331_v45  ;;  %v5355_v35 = vld [vmem:[%s7156_s21 + $0x172] sm:$0xff] }
  0x90   : > { %6879 = vmatprep.subr.msk.bf16.mxu0 %vm462_vm0, %v5407_v27  ;;  %v5357_v27 = vld [vmem:[%s7156_s21 + $0x18a] sm:$0xff] }
  0x92   : > { %6041 = vmatmul.mubr.msk.bf16.gmra.mrb[8].mxu1 %vm413_vm1, %v7264_v57 }
  0x93   : > { %6044 = vmatprep.mubr.msk.bf16.mxu1 %vm413_vm1, %v7274_v62 }
  0x96   : > { %6139 = vmatmul.mubr.msk.bf16.gmra.mrb[4].mxu0 %vm413_vm1, %v7335_v47 }
  0x97   : > { %6142 = vmatprep.mubr.msk.bf16.mxu0 %vm413_vm1, %v7355_v2 }
  0x9a   : > { %6045 = vmatmul.mubr.msk.bf16.gmra.mrb[12].mxu1 %vm413_vm1, %v7276_v63 }
  0x9b   : > { %6048 = vmatprep.mubr.msk.bf16.mxu1 %vm413_vm1, %v7286_v6 }
  0x9e   : > { %6143 = vmatmul.mubr.msk.bf16.gmra.mrb[8].mxu0 %vm413_vm1, %v7359_v4 }
  0x9f   : > { %6146 = vmatprep.mubr.msk.bf16.mxu0 %vm413_vm1, %v7377_v16 }
  0xa2   : > { %6049 = vmatmul.mubr.msk.bf16.gmra.mrb[16].mxu1 %vm413_vm1, %v7288_v7 }
  0xa3   : > { %6052 = vmatprep.mubr.msk.bf16.mxu1 %vm413_vm1, %v7310_v28 }
  0xa6   : > { %6147 = vmatmul.mubr.msk.bf16.gmra.mrb[12].mxu0 %vm413_vm1, %v7381_v20 }
  0xa7   : > { %6150 = vmatprep.mubr.msk.bf16.mxu0 %vm413_vm1, %v7394_v33 }
  0xaa   : > { %6053 = vmatmul.mubr.msk.bf16.gmra.mrb[20].mxu1 %vm413_vm1, %v7314_v32 }
  0xab   : > { %6056 = vmatprep.mubr.msk.bf16.mxu1 %vm413_vm1, %v7333_v46 }
  0xae   : > { %6151 = vmatmul.mubr.msk.bf16.gmra.mrb[16].mxu0 %vm413_vm1, %v7396_v34 }
  0xaf   : > { %6154 = vmatprep.mubr.msk.bf16.mxu0 %vm413_vm1, %v7416_v41 }
  0xb2   : > { %6057 = vmatmul.mubr.msk.bf16.gmra.mrb[24].mxu1 %vm413_vm1, %v7337_v48 }
  0xb3   : > { %6060 = vmatprep.mubr.msk.bf16.mxu1 %vm413_vm1, %v7357_v3 }
  0xb6   : > { %6155 = vmatmul.mubr.msk.bf16.gmra.mrb[20].mxu0 %vm413_vm1, %v7418_v44 }
  0xb7   : > { %6158 = vmatprep.mubr.msk.bf16.mxu0 %vm413_vm1, %v7432_v58 }
  0xba   : > { %6061 = vmatmul.mubr.msk.bf16.gmra.mrb[28].mxu1 %vm413_vm1, %v7361_v5 }
  0xbe   : > { %6159 = vmatmul.mubr.msk.bf16.gmra.mrb[24].mxu0 %vm413_vm1, %v7434_v59 }
  0xbf   : > { %6162 = vmatprep.mubr.msk.bf16.mxu0 %vm413_vm1, %v7446_v8 }
  0xc6   : > { %6163 = vmatmul.mubr.msk.bf16.gmra.mrb[28].mxu0 %vm413_vm1, %v7491_v43 }
  0xc7   : > { %6168 = vmatprep.mubr.msk.bf16.mxu0 %vm413_vm1, %v7164_v10  ;;  %v5348_v10 = vld [vmem:[%s7156_s21 + $0x122] sm:$0xff] }
  0xce   : > { %6169 = vmatmul.mubr.msk.bf16.vlgmr.msra.gmra.mrb[0].mxu0 %vm413_vm1, %v7167_v12  ;;  %v5349_v12 = vld [vmem:[%s7156_s21 + $0x12a] sm:$0xff] }
  0xcf   : > { %6201 = vmatpush3.bf16.msra.mxu0 %v2116_v21  ;;  %6172 = vmatprep.mubr.msk.bf16.mxu0 %vm413_vm1, %v7182_v18  ;;  %v7532_v18 = vpack.c.bf16 %v5349_v12, %v5348_v10  ;;  %v5487_v21 = vld [vmem:[%s7156_s21 + $0xda] sm:$0xff]  ;;  %v5489_v12 = vld [vmem:[%s7156_s21 + $0xf2] sm:$0xff] }
  0xd0   : > { %6880 = vmatprep.subr.msk.bf16.mxu0 %vm462_vm0, %v5456_v22  ;;  %v5488_v22 = vld [vmem:[%s7156_s21 + $0xe2] sm:$0xff] }
  0xd1   : > { %6090 = vmatprep.mubr.msk.bf16.mxu1 %vm413_vm1, %v7532_v18 }
  0xd6   : > { %6173 = vmatmul.mubr.msk.bf16.gmra.mrb[4].mxu0 %vm413_vm1, %v7184_v19  ;;  %v5350_v19 = vld [vmem:[%s7156_s21 + $0x13a] sm:$0xff] }
  0xd7   : > { %6176 = vmatprep.mubr.msk.bf16.mxu0 %vm413_vm1, %v7194_v24  ;;  %v5351_v24 = vld [vmem:[%s7156_s21 + $0x142] sm:$0xff] }
  0xd8   : > { %v7546_v23 = vpack.c.bf16 %v5351_v24, %v5350_v19  ;;  %v5490_v19 = vld [vmem:[%s7156_s21 + $0xfa] sm:$0xff] }
  0xda   : > { %6091 = vmatmul.mubr.msk.bf16.vlgmr.msra.gmra.mrb[24].mxu1 %vm413_vm1, %v7546_v23 }
  0xde   : > { %6177 = vmatmul.mubr.msk.bf16.gmra.mrb[8].mxu0 %vm413_vm1, %v7196_v25  ;;  %v5352_v25 = vld [vmem:[%s7156_s21 + $0x152] sm:$0xff] }
  0xdf   : > { %6180 = vmatprep.mubr.msk.bf16.mxu0 %vm413_vm1, %v7206_v30  ;;  %v5353_v30 = vld [vmem:[%s7156_s21 + $0x15a] sm:$0xff] }
  0xe0   : > { %v7548_v26 = vpack.c.bf16 %v5353_v30, %v5352_v25  ;;  %v2644_v30 = vpack.c.bf16 %v5488_v22, %v5487_v21 }
  0xe2   : > { %6094 = vmatprep.mubr.msk.bf16.mxu1 %vm413_vm1, %v7548_v26 }
  0xe6   : > { %6181 = vmatmul.mubr.msk.bf16.gmra.mrb[12].mxu0 %vm413_vm1, %v7208_v31  ;;  %v5354_v31 = vld [vmem:[%s7156_s21 + $0x16a] sm:$0xff] }
  0xe7   : > { %6184 = vmatprep.mubr.msk.bf16.mxu0 %vm413_vm1, %v7218_v36  ;;  %v7560_v36 = vpack.c.bf16 %v5355_v35, %v5354_v31  ;;  %v2645_v31 = vpack.c.bf16 %v5490_v19, %v5489_v12 }
  0xe9   : > { %6095 = vmatmul.mubr.msk.bf16.gmra.mrb[28].mxu1 %vm413_vm1, %v7560_v36 }
  0xee   : > { %6185 = vmatmul.mubr.msk.bf16.gmra.mrb[16].mxu0 %vm413_vm1, %v7220_v37  ;;  %v5356_v37 = vld [vmem:[%s7156_s21 + $0x182] sm:$0xff] }
  0xef   : > { %6188 = vmatprep.mubr.msk.bf16.mxu0 %vm413_vm1, %v7230_v42  ;;  %v7574_v42 = vpack.c.bf16 %v5357_v27, %v5356_v37  ;;  %v5491_v37 = vld [vmem:[%s7156_s21 + $0x10a] sm:$0xff]  ;;  %v5492_v27 = vld [vmem:[%s7156_s21 + $0x112] sm:$0xff] }
  0xf6   : > { %6189 = vmatmul.mubr.msk.bf16.gmra.mrb[20].mxu0 %vm413_vm1, %v7532_v18 }
  0xf7   : > { %6192 = vmatprep.mubr.msk.bf16.mxu0 %vm413_vm1, %v7546_v23 }
  0xfe   : > { %6193 = vmatmul.mubr.msk.bf16.gmra.mrb[24].mxu0 %vm413_vm1, %v7548_v26 }
  0xff   : > { %6196 = vmatprep.mubr.msk.bf16.mxu0 %vm413_vm1, %v7560_v36 }
 0x106   : > { %6197 = vmatmul.mubr.msk.bf16.gmra.mrb[28].mxu0 %vm413_vm1, %v7574_v42 }
 0x107   : > { %6202 = vmatprep.mubr.msk.bf16.mxu0 %vm413_vm1, %v7243_v49  ;;  %v5405_v49 = vld [vmem:[%s7156_s21 + $0x198] sm:$0xff] }
 0x10e   : > { %6203 = vmatmul.mubr.msk.bf16.vlgmr.msra.gmra.mrb[0].mxu0 %vm413_vm1, %v7245_v50  ;;  %v5406_v50 = vld [vmem:[%s7156_s21 + $0x1a0] sm:$0xff] }
 0x10f   : > { %6235 = vmatpush3.bf16.msra.mxu0 %v2410_v38  ;;  %6206 = vmatprep.mubr.msk.bf16.mxu0 %vm413_vm1, %v7262_v56  ;;  %v2064_v56 = vpack.c.bf16 %v5406_v50, %v5405_v49  ;;  %v2646_v50 = vpack.c.bf16 %v5492_v27, %v5491_v37 }
 0x110   : > { %6881 = vmatprep.subr.msk.bf16.mxu0 %vm462_vm0, %v5505_v39 }
 0x116   : > { %6207 = vmatmul.mubr.msk.bf16.gmra.mrb[4].mxu0 %vm413_vm1, %v7264_v57  ;;  %v2704_v57 = vsel %vm462_vm0, %v5505_v39, 0 }
 0x117   : > { %6210 = vmatprep.mubr.msk.bf16.mxu0 %vm413_vm1, %v7274_v62 }
 0x11e   : > { %6211 = vmatmul.mubr.msk.bf16.gmra.mrb[8].mxu0 %vm413_vm1, %v7276_v63  ;;  %v5454_v63 = vld [vmem:[%s7156_s21 + $0x199] sm:$0xff] }
 0x11f   : > { %6214 = vmatprep.mubr.msk.bf16.mxu0 %vm413_vm1, %v7286_v6  ;;  %v5455_v6 = vld [vmem:[%s7156_s21 + $0x1a1] sm:$0xff] }
 0x126   : > { %6215 = vmatmul.mubr.msk.bf16.gmra.mrb[12].mxu0 %vm413_vm1, %v7288_v7 }
 0x127   : > { %6218 = vmatprep.mubr.msk.bf16.mxu0 %vm413_vm1, %v7310_v28  ;;  %v5473_v28 = vld [vmem:[%s7156_s21 + $0x32] sm:$0xff] }
 0x12e   : > { %6219 = vmatmul.mubr.msk.bf16.gmra.mrb[16].mxu0 %vm413_vm1, %v7314_v32 }
 0x12f   : > { %6222 = vmatprep.mubr.msk.bf16.mxu0 %vm413_vm1, %v7333_v46  ;;  %v2358_v46 = vpack.c.bf16 %v5455_v6, %v5454_v63  ;;  %v5504_v63 = vld [vmem:[%s7156_s21 + $0x1a2] sm:$0xff] }
 0x136   : > { %6223 = vmatmul.mubr.msk.bf16.gmra.mrb[20].mxu0 %vm413_vm1, %v7337_v48 }
 0x137   : > { %6226 = vmatprep.mubr.msk.bf16.mxu0 %vm413_vm1, %v7357_v3  ;;  %v5476_v3 = vld [vmem:[%s7156_s21 + $0x52] sm:$0xff] }
 0x13e   : > { %6227 = vmatmul.mubr.msk.bf16.gmra.mrb[24].mxu0 %vm413_vm1, %v7361_v5  ;;  %v5477_v5 = vld [vmem:[%s7156_s21 + $0x62] sm:$0xff] }
 0x13f   : > { %6230 = vmatprep.mubr.msk.bf16.mxu0 %vm413_vm1, %v7379_v17 }
 0x146   : > { %6231 = vmatmul.mubr.msk.bf16.gmra.mrb[28].mxu0 %vm413_vm1, %v2064_v56 }
 0x147   : > { %6236 = vmatprep.mubr.msk.bf16.mxu0 %vm413_vm1, %v7312_v29  ;;  %v5474_v29 = vld [vmem:[%s7156_s21 + $0x3a] sm:$0xff] }
 0x14e   : > { %6237 = vmatmul.mubr.msk.bf16.vlgmr.msra.gmra.mrb[0].mxu0 %vm413_vm1, %v7331_v45 }
 0x14f   : > { %6269 = vmatpush3.bf16.msra.mxu0 %v2704_v57  ;;  %6240 = vmatprep.mubr.msk.bf16.mxu0 %vm413_vm1, %v7335_v47  ;;  %v2637_v47 = vpack.c.bf16 %v5474_v29, %v5473_v28  ;;  %v5503_v57 = vld [vmem:[%s7156_s21 + $0x19a] sm:$0xff] }
 0x155   : > { %v7645_v62 = vpop.f32.mrb[0].mxu1 }
 0x156   : > { %6241 = vmatmul.mubr.msk.bf16.gmra.mrb[4].mxu0 %vm413_vm1, %v7355_v2  ;;  %v7651_v7 = vpop.f32.mrb[1].mxu1  ;;  %v5475_v2 = vld [vmem:[%s7156_s21 + $0x4a] sm:$0xff] }
 0x157   : > { %6244 = vmatprep.mubr.msk.bf16.mxu0 %vm413_vm1, %v7359_v4  ;;  %v7655_v32 = vpop.f32.mrb[2].mxu1 }
 0x158   : > { %v7657_v45 = vpop.f32.mrb[3].mxu1 }
 0x15d   : > { %v7660_v48 = vpop.f32.mrb[4].mxu1 }
 0x15e   : > { %6245 = vmatmul.mubr.msk.bf16.gmra.mrb[8].mxu0 %vm413_vm1, %v7377_v16  ;;  %v7665_v4 = vpop.f32.mrb[5].mxu1  ;;  %v5478_v16 = vld [vmem:[%s7156_s21 + $0x6a] sm:$0xff] }
 0x15f   : > { %6248 = vmatprep.mubr.msk.bf16.mxu0 %vm413_vm1, %v7381_v20  ;;  %v7669_v17 = vpop.f32.mrb[6].mxu1 }
 0x160   : > { %v7671_v20 = vpop.f32.mrb[7].mxu1 }
 0x165   : > { %v7674_v51 = vpop.f32.mrb[8].mxu1 }
 0x166   : > { %6249 = vmatmul.mubr.msk.bf16.gmra.mrb[12].mxu0 %vm413_vm1, %v7394_v33  ;;  %v2638_v33 = vpack.c.bf16 %v5476_v3, %v5475_v2  ;;  %v6926_v2 = vld [vmem:[%s8335_s3 + $0x18] sm:$0xff]   ;;  %v7796_v3 = vld [vmem:[%s8335_s3] sm:$0xff]  }
 0x167   : > { %6252 = vmatprep.mubr.msk.bf16.mxu0 %vm413_vm1, %v7396_v34  ;;  %v2639_v34 = vpack.c.bf16 %v5478_v16, %v5477_v5  ;;  %v7802_v16 = vld [vmem:[%s8334_s2] ss:$0 sm:$0xff] }
 0x16e   : > { %6253 = vmatmul.mubr.msk.bf16.gmra.mrb[16].mxu0 %vm413_vm1, %v7416_v41  ;;  %v5480_v41 = vld [vmem:[%s7156_s21 + $0x82] sm:$0xff] }
 0x16f   : > { %6256 = vmatprep.mubr.msk.bf16.mxu0 %vm413_vm1, %v7418_v44  ;;  %v7679_v44 = vpop.f32.mrb[9].mxu1 }
 0x170   : > { %v7683_v54 = vpop.f32.mrb[10].mxu1 }
 0x171   : > { %v7685_v55 = vpop.f32.mrb[11].mxu1 }
 0x172   : > { %v7688_v60 = vpop.f32.mrb[12].mxu1 }
 0x173   : > { %v7693_v9 = vpop.f32.mrb[13].mxu1 }
 0x174   : > { %v7697_v14 = vpop.f32.mrb[14].mxu1 }
 0x175   : > { %v7699_v15 = vpop.f32.mrb[15].mxu1 }
 0x176   : > { %6257 = vmatmul.mubr.msk.bf16.gmra.mrb[20].mxu0 %vm413_vm1, %v7432_v58  ;;  %v2640_v58 = vpack.c.bf16 %v5480_v41, %v5479_v40 }
 0x177   : > { %6260 = vmatprep.mubr.msk.bf16.mxu0 %vm413_vm1, %v7434_v59  ;;  %v2641_v59 = vpack.c.bf16 %v5482_v53, %v5481_v52 }
 0x17e   : > { %6261 = vmatmul.mubr.msk.bf16.gmra.mrb[24].mxu0 %vm413_vm1, %v7446_v8  ;;  %v5484_v8 = vld [vmem:[%s7156_s21 + $0xb2] sm:$0xff] }
 0x17f   : > { %6264 = vmatprep.mubr.msk.bf16.mxu0 %vm413_vm1, %v7491_v43  ;;  %v2642_v0 = vpack.c.bf16 %v5484_v8, %v5483_v61  ;;  %v7702_v43 = vpop.f32.mrb[16].mxu1 }
 0x180   : > { %v7707_v10 = vpop.f32.mrb[17].mxu1 }
 0x181   : > { %v7711_v24 = vpop.f32.mrb[18].mxu1 }
 0x182   : > { %v7713_v25 = vpop.f32.mrb[19].mxu1 }
 0x183   : > { %v7716_v35 = vpop.f32.mrb[20].mxu1 }
 0x184   : > { %v7721_v38 = vpop.f32.mrb[21].mxu1 }
 0x185   : > { %v7723_v39 = vpop.f32.mrb[22].mxu1 }
 0x186   : > { %6265 = vmatmul.mubr.msk.bf16.gmra.mrb[28].mxu0 %vm413_vm1, %v2358_v46  ;;  %v7725_v49 = vpop.f32.mrb[23].mxu1 }
 0x187   : > { %6270 = vmatprep.mubr.msk.bf16.mxu0 %vm413_vm1, %v2637_v47  ;;  %v6925_v47 = vld [vmem:[%s8335_s3 + $0x10] sm:$0xff]  }
 0x188   : > { %6302 = vmatprep.subr.bf16.mxu1 %v6925_v47 }
 0x189   : > { %6303 = vmatpush3.bf16.msra.mxu1 %v6925_v47 }
 0x18a   : > { %6304 = vmatprep.subr.bf16.mxu1 %v6926_v2 }
 0x18d   : > { %6305 = vmatpush3.bf16.msra.mxu1 %v6926_v2 }
 0x18e   : > { %6271 = vmatmul.mubr.msk.bf16.vlgmr.msra.gmra.mrb[0].mxu0 %vm413_vm1, %v2638_v33  ;;  %6314 = vmatprep.subr.bf16.mxu1 %v7796_v3 }
 0x18f   : > { %6274 = vmatprep.mubr.msk.bf16.mxu0 %vm413_vm1, %v2639_v34 }
 0x196   : > { %6275 = vmatmul.mubr.msk.bf16.gmra.mrb[4].mxu0 %vm413_vm1, %v2640_v58 }
 0x197   : > { %6278 = vmatprep.mubr.msk.bf16.mxu0 %vm413_vm1, %v2641_v59 }
 0x19e   : > { %6279 = vmatmul.mubr.msk.bf16.gmra.mrb[8].mxu0 %vm413_vm1, %v2642_v0 }
 0x19f   : > { %6282 = vmatprep.mubr.msk.bf16.mxu0 %vm413_vm1, %v2643_v1 }
 0x1a6   : > { %6283 = vmatmul.mubr.msk.bf16.gmra.mrb[12].mxu0 %vm413_vm1, %v2644_v30 }
 0x1a7   : > { %6286 = vmatprep.mubr.msk.bf16.mxu0 %vm413_vm1, %v2645_v31 }
 0x1ad   : > { %v7736_v56 = vpop.f32.mrb[24].mxu1 }
 0x1ae   : > { %6287 = vmatmul.mubr.msk.bf16.gmra.mrb[16].mxu0 %vm413_vm1, %v2646_v50  ;;  %v7742_v6 = vpop.f32.mrb[25].mxu1 }
 0x1af   : > { %6290 = vmatprep.mubr.msk.bf16.mxu0 %vm413_vm1, %v7532_v18  ;;  %v7744_v28 = vpop.f32.mrb[26].mxu1 }
 0x1b0   : > { %v7746_v18 = vpop.f32.mrb[27].mxu1 }
 0x1b6   : > { %6291 = vmatmul.mubr.msk.bf16.gmra.mrb[20].mxu0 %vm413_vm1, %v7546_v23  ;;  %v2652_v23 = vpack.c.bf16 %v5504_v63, %v5503_v57 }
 0x1b7   : > { %6294 = vmatprep.mubr.msk.bf16.mxu0 %vm413_vm1, %v7548_v26 }
 0x1bc   : > { %v7749_v26 = vpop.f32.mrb[28].mxu1 }
 0x1bd   : > { %v7751_v29 = vpop.f32.mrb[29].mxu1 }
 0x1be   : > { %6295 = vmatmul.mubr.msk.bf16.gmra.mrb[24].mxu0 %vm413_vm1, %v7560_v36  ;;  %v7753_v36 = vpop.f32.mrb[30].mxu1 }
 0x1bf   : > { %6298 = vmatprep.mubr.msk.bf16.mxu0 %vm413_vm1, %v7574_v42  ;;  %v7755_v46 = vpop.f32.mrb[31].mxu1  ;;  %v7043_v42 = vmov 0.0  }
 0x1c0   : > { %282 = vst.msk [vmem:[#allocation2 + $0x10] sm:$0xff] %vm278_vm2, %v7043_v42  ;;  %279 = vst.msk [vmem:[#allocation2] sm:$0xff] %vm278_vm2, %v7043_v42 }
 0x1c1   : > { %284 = vst.msk [vmem:[#allocation2 + $0x20] sm:$0xff] %vm278_vm2, %v7043_v42  ;;  %286 = vst.msk [vmem:[#allocation2 + $0x30] sm:$0xff] %vm278_vm2, %v7043_v42 }
 0x1c2   : > { %288 = vst.msk [vmem:[#allocation2 + $0x40] sm:$0xff] %vm278_vm2, %v7043_v42  ;;  %290 = vst.msk [vmem:[#allocation2 + $0x50] sm:$0xff] %vm278_vm2, %v7043_v42 }
 0x1c3   : > { %292 = vst.msk [vmem:[#allocation2 + $0x60] sm:$0xff] %vm278_vm2, %v7043_v42  ;;  %294 = vst.msk [vmem:[#allocation2 + $0x70] sm:$0xff] %vm278_vm2, %v7043_v42 }
 0x1c4   : > { %296 = vst.msk [vmem:[#allocation2 + $0x80] sm:$0xff] %vm278_vm2, %v7043_v42  ;;  %298 = vst.msk [vmem:[#allocation2 + $0x90] sm:$0xff] %vm278_vm2, %v7043_v42 }
 0x1c5   : > { %283 = vst.msk [vmem:[#allocation2 + $0x18] sm:$0x3] %vm280_vm3, %v7043_v42  ;;  %281 = vst.msk [vmem:[#allocation2 + $0x8] sm:$0x3] %vm280_vm3, %v7043_v42 }
 0x1c6   : > { %6299 = vmatmul.mubr.msk.bf16.gmra.mrb[28].mxu0 %vm413_vm1, %v2652_v23  ;;  %285 = vst.msk [vmem:[#allocation2 + $0x28] sm:$0x3] %vm280_vm3, %v7043_v42  ;;  %287 = vst.msk [vmem:[#allocation2 + $0x38] sm:$0x3] %vm280_vm3, %v7043_v42 }
 0x1c7   : > { %289 = vst.msk [vmem:[#allocation2 + $0x48] sm:$0x3] %vm280_vm3, %v7043_v42  ;;  %291 = vst.msk [vmem:[#allocation2 + $0x58] sm:$0x3] %vm280_vm3, %v7043_v42 }
 0x1c8   : > { %293 = vst.msk [vmem:[#allocation2 + $0x68] sm:$0x3] %vm280_vm3, %v7043_v42  ;;  %295 = vst.msk [vmem:[#allocation2 + $0x78] sm:$0x3] %vm280_vm3, %v7043_v42 }
 0x1c9   : > { %297 = vst.msk [vmem:[#allocation2 + $0x88] sm:$0x3] %vm280_vm3, %v7043_v42  ;;  %299 = vst.msk [vmem:[#allocation2 + $0x98] sm:$0x3] %vm280_vm3, %v7043_v42 }
 0x1ca   : > { %306 = vst.msk [vmem:[#allocation3 + $0x20] sm:$0xff] %vm300_vm8, %v7043_v42  ;;  %301 = vst.msk [vmem:[#allocation3] sm:$0xff] %vm300_vm8, %v7043_v42 }
 0x1cb   : > { %304 = vst.msk [vmem:[#allocation3 + $0x10] sm:$0xff] %vm300_vm8, %v7043_v42  ;;  %308 = vst.msk [vmem:[#allocation3 + $0x30] sm:$0xff] %vm300_vm8, %v7043_v42 }
 0x1cc   : > { %310 = vst.msk [vmem:[#allocation3 + $0x40] sm:$0xff] %vm300_vm8, %v7043_v42  ;;  %312 = vst.msk [vmem:[#allocation3 + $0x50] sm:$0xff] %vm300_vm8, %v7043_v42 }
 0x1cd   : > { %303 = vst.msk [vmem:[#allocation3 + $0x8] sm:$0x3] %vm302_vm9, %v7043_v42  ;;  %305 = vst.msk [vmem:[#allocation3 + $0x18] sm:$0x3] %vm302_vm9, %v7043_v42 }
 0x1ce   : > { %307 = vst.msk [vmem:[#allocation3 + $0x28] sm:$0x3] %vm302_vm9, %v7043_v42  ;;  %309 = vst.msk [vmem:[#allocation3 + $0x38] sm:$0x3] %vm302_vm9, %v7043_v42 }
 0x1cf   : > { %311 = vst.msk [vmem:[#allocation3 + $0x48] sm:$0x3] %vm302_vm9, %v7043_v42  ;;  %313 = vst.msk [vmem:[#allocation3 + $0x58] sm:$0x3] %vm302_vm9, %v7043_v42  ;;  %v8121_v42 = vld [vmem:[%s8337_s5] sm:$0xff]  }
 0x261   : > { %v6272_v5 = vpop.f32.mrb[0].mxu0 }
 0x262   : > { %v6520_v33 = vadd.f32 %v6272_v5, %v7645_v62  ;;  %v2740_v34 = vpop.f32.mrb[1].mxu0 }
 0x263   : > { %v6521_v40 = vadd.f32 %v2740_v34, %v7651_v7  ;;  %v6273_v41 = vpop.f32.mrb[2].mxu0 }
 0x264   : > { %v2908_v52 = vadd.f32 %v6520_v33, %v7802_v16  ;;  %v6522_v53 = vadd.f32 %v6273_v41, %v7655_v32  ;;  %v2743_v58 = vpop.f32.mrb[3].mxu0 }
 0x265   : > { %v2906_v59 = vadd.f32 %v6521_v40, %v7802_v16  ;;  %v6523_v61 = vadd.f32 %v2743_v58, %v7657_v45 }
 0x266   : > { %v2940_v8 = vmax.f32 %v2908_v52, 0.0  ;;  %v2909_v11 = vadd.f32 %v6522_v53, %v7802_v16 }
 0x267   : > { %v2938_v13 = vmax.f32 %v2906_v59, 0.0  ;;  %v2907_v0 = vadd.f32 %v6523_v61, %v7802_v16 }
 0x268   : > { %v2941_v62 = vmax.f32 %v2909_v11, 0.0 }
 0x269   : > { %v2970_v1 = vmax.f32 %v2938_v13, %v2940_v8  ;;  %v2939_v21 = vmax.f32 %v2907_v0, 0.0  ;;  %v6276_v7 = vpop.f32.mrb[4].mxu0 }
 0x26a   : > { %v6524_v22 = vadd.f32 %v6276_v7, %v7660_v48  ;;  %v2756_v12 = vpop.f32.mrb[5].mxu0  ;;  %v3135_v7 = vld [vmem:[#allocation2 + $0x1] sm:$0xff] }
 0x26b   : > { %v2994_v32 = vrot.slane %v2970_v1, 1  ;;  %v2971_v19 = vmax.f32 %v2939_v21, %v2941_v62  ;;  %v6525_v30 = vadd.f32 %v2756_v12, %v7665_v4  ;;  %v6277_v45 = vpop.f32.mrb[6].mxu0 }
 0x26c   : > { %v2912_v31 = vadd.f32 %v6524_v22, %v7802_v16  ;;  %v6526_v37 = vadd.f32 %v6277_v45, %v7669_v17  ;;  %v2759_v27 = vpop.f32.mrb[7].mxu0 }
 0x26d   : > { %v3010_v50 = vmax.f32 %v2970_v1, %v2994_v32  ;;  %v3063_v57 = vrot.slane %v2971_v19, 1  ;;  %v2910_v63 = vadd.f32 %v6525_v30, %v7802_v16  ;;  %v6527_v48 = vadd.f32 %v2759_v27, %v7671_v20 }
 0x26e   : > { %v2944_v23 = vmax.f32 %v2912_v31, 0.0  ;;  %v2913_v47 = vadd.f32 %v6526_v37, %v7802_v16 }
 0x26f   : > { %3020 = vst.msk [vmem:[#allocation2 + $0x11] sm:$0x1] %vm3019_vm4, %v3010_v50  ;;  %v3079_v4 = vmax.f32 %v2971_v19, %v3063_v57  ;;  %v2942_v17 = vmax.f32 %v2910_v63, 0.0  ;;  %v2911_v2 = vadd.f32 %v6527_v48, %v7802_v16 }
 0x270   : > { %3029 = vst.msk [vmem:[#allocation2 + $0x10] sm:$0x4] %vm3028_vm5, %v3010_v50  ;;  %v2945_v5 = vmax.f32 %v2913_v47, 0.0 }
 0x271   : > { %3038 = vst.msk [vmem:[#allocation2 + $0xf] sm:$0x10] %vm3037_vm6, %v3010_v50  ;;  %3103 = vst.msk [vmem:[#allocation2 + $0x13] sm:$0x10] %vm3037_vm6, %v3079_v4  ;;  %v2972_v20 = vmax.f32 %v2942_v17, %v2944_v23  ;;  %v2943_v33 = vmax.f32 %v2911_v2, 0.0  ;;  %v6280_v34 = vpop.f32.mrb[8].mxu0 }
 0x272   : > { %3047 = vst.msk [vmem:[#allocation2 + $0xe] sm:$0x40] %vm3046_vm7, %v3010_v50  ;;  %3111 = vst.msk [vmem:[#allocation2 + $0x12] sm:$0x40] %vm3046_vm7, %v3079_v4  ;;  %v6528_v40 = vadd.f32 %v6280_v34, %v7674_v51  ;;  %v2772_v41 = vpop.f32.mrb[9].mxu0 }
 0x273   : > { %3087 = vst.msk [vmem:[#allocation2 + $0x15] sm:$0x1] %vm3019_vm4, %v3079_v4  ;;  %v2995_v52 = vrot.slane %v2972_v20, 1  ;;  %v2973_v53 = vmax.f32 %v2943_v33, %v2945_v5  ;;  %v6529_v58 = vadd.f32 %v2772_v41, %v7679_v44  ;;  %v6281_v59 = vpop.f32.mrb[10].mxu0 }
 0x274   : > { %3095 = vst.msk [vmem:[#allocation2 + $0x14] sm:$0x4] %vm3028_vm5, %v3079_v4  ;;  %v2916_v61 = vadd.f32 %v6528_v40, %v7802_v16  ;;  %v6530_v8 = vadd.f32 %v6281_v59, %v7683_v54  ;;  %v2775_v11 = vpop.f32.mrb[11].mxu0 }
 0x275   : > { %v3011_v13 = vmax.f32 %v2972_v20, %v2995_v52  ;;  %v3064_v0 = vrot.slane %v2973_v53, 1  ;;  %v2914_v62 = vadd.f32 %v6529_v58, %v7802_v16  ;;  %v6531_v1 = vadd.f32 %v2775_v11, %v7685_v55 }
 0x276   : > { %v2948_v21 = vmax.f32 %v2916_v61, 0.0  ;;  %v2917_v51 = vadd.f32 %v6530_v8, %v7802_v16 }
 0x277   : > { %3021 = vst.msk [vmem:[#allocation2 + $0x21] sm:$0x1] %vm3019_vm4, %v3011_v13  ;;  %v3080_v44 = vmax.f32 %v2973_v53, %v3064_v0  ;;  %v2946_v54 = vmax.f32 %v2914_v62, 0.0  ;;  %v2915_v22 = vadd.f32 %v6531_v1, %v7802_v16 }
 0x278   : > { %3030 = vst.msk [vmem:[#allocation2 + $0x20] sm:$0x4] %vm3028_vm5, %v3011_v13  ;;  %v2949_v12 = vmax.f32 %v2917_v51, 0.0 }
 0x279   : > { %3039 = vst.msk [vmem:[#allocation2 + $0x1f] sm:$0x10] %vm3037_vm6, %v3011_v13  ;;  %3104 = vst.msk [vmem:[#allocation2 + $0x23] sm:$0x10] %vm3037_vm6, %v3080_v44  ;;  %v2974_v55 = vmax.f32 %v2946_v54, %v2948_v21  ;;  %v2947_v19 = vmax.f32 %v2915_v22, 0.0  ;;  %v6284_v30 = vpop.f32.mrb[12].mxu0 }
 0x27a   : > { %3048 = vst.msk [vmem:[#allocation2 + $0x1e] sm:$0x40] %vm3046_vm7, %v3011_v13  ;;  %3112 = vst.msk [vmem:[#allocation2 + $0x22] sm:$0x40] %vm3046_vm7, %v3080_v44  ;;  %v6532_v31 = vadd.f32 %v6284_v30, %v7688_v60  ;;  %v2788_v37 = vpop.f32.mrb[13].mxu0 }
 0x27b   : > { %v7840_v32 = vld [vmem:[#allocation2 + $0x11] sm:$0xff]  ;;  %3088 = vst.msk [vmem:[#allocation2 + $0x25] sm:$0x1] %vm3019_vm4, %v3080_v44  ;;  %v2996_v27 = vrot.slane %v2974_v55, 1  ;;  %v2975_v50 = vmax.f32 %v2947_v19, %v2949_v12  ;;  %v6533_v57 = vadd.f32 %v2788_v37, %v7693_v9  ;;  %v6285_v63 = vpop.f32.mrb[14].mxu0 }
 0x27c   : > { %3096 = vst.msk [vmem:[#allocation2 + $0x24] sm:$0x4] %vm3028_vm5, %v3080_v44  ;;  %v3143_v45 = vpack.c.bf16 %v7840_v32, %v3135_v7  ;;  %v2920_v48 = vadd.f32 %v6532_v31, %v7802_v16  ;;  %v6534_v23 = vadd.f32 %v6285_v63, %v7697_v14  ;;  %v2791_v47 = vpop.f32.mrb[15].mxu0  ;;  %v6928_v31 = vld [vmem:[%s8335_s3 + $0x8] sm:$0xff]  }
 0x27d   : > { %v3012_v4 = vmax.f32 %v2974_v55, %v2996_v27  ;;  %v3065_v17 = vrot.slane %v2975_v50, 1  ;;  %v2918_v2 = vadd.f32 %v6533_v57, %v7802_v16  ;;  %v6535_v5 = vadd.f32 %v2791_v47, %v7699_v15 }
 0x27e   : > { %6306 = vmatprep.mubr.msk.bf16.mxu1 %vm278_vm2, %v3143_v45  ;;  %v2952_v60 = vmax.f32 %v2920_v48, 0.0  ;;  %v2921_v20 = vadd.f32 %v6534_v23, %v7802_v16 }
 0x27f   : > { %3022 = vst.msk [vmem:[#allocation2 + $0x31] sm:$0x1] %vm3019_vm4, %v3012_v4  ;;  %v3081_v9 = vmax.f32 %v2975_v50, %v3065_v17  ;;  %v2950_v14 = vmax.f32 %v2918_v2, 0.0  ;;  %v2919_v33 = vadd.f32 %v6535_v5, %v7802_v16 }
 0x280   : > { %3031 = vst.msk [vmem:[#allocation2 + $0x30] sm:$0x4] %vm3028_vm5, %v3012_v4  ;;  %v2953_v34 = vmax.f32 %v2921_v20, 0.0 }
 0x281   : > { %3040 = vst.msk [vmem:[#allocation2 + $0x2f] sm:$0x10] %vm3037_vm6, %v3012_v4  ;;  %3105 = vst.msk [vmem:[#allocation2 + $0x33] sm:$0x10] %vm3037_vm6, %v3081_v9  ;;  %v2976_v15 = vmax.f32 %v2950_v14, %v2952_v60  ;;  %v2951_v41 = vmax.f32 %v2919_v33, 0.0  ;;  %v6288_v52 = vpop.f32.mrb[16].mxu0 }
 0x282   : > { %3049 = vst.msk [vmem:[#allocation2 + $0x2e] sm:$0x40] %vm3046_vm7, %v3012_v4  ;;  %3113 = vst.msk [vmem:[#allocation2 + $0x32] sm:$0x40] %vm3046_vm7, %v3081_v9  ;;  %v6536_v58 = vadd.f32 %v6288_v52, %v7702_v43  ;;  %v2804_v59 = vpop.f32.mrb[17].mxu0 }
 0x283   : > { %v7860_v40 = vld [vmem:[#allocation2 + $0x21] sm:$0xff]  ;;  %3089 = vst.msk [vmem:[#allocation2 + $0x35] sm:$0x1] %vm3019_vm4, %v3081_v9  ;;  %v2997_v61 = vrot.slane %v2976_v15, 1  ;;  %v2977_v8 = vmax.f32 %v2951_v41, %v2953_v34  ;;  %v6537_v11 = vadd.f32 %v2804_v59, %v7707_v10  ;;  %v6289_v13 = vpop.f32.mrb[18].mxu0 }
 0x284   : > { %3097 = vst.msk [vmem:[#allocation2 + $0x34] sm:$0x4] %vm3028_vm5, %v3081_v9  ;;  %v3566_v53 = vpack.c.bf16 %v7860_v40, %v7840_v32  ;;  %v2924_v0 = vadd.f32 %v6536_v58, %v7802_v16  ;;  %v6538_v62 = vadd.f32 %v6289_v13, %v7711_v24  ;;  %v2807_v1 = vpop.f32.mrb[19].mxu0  ;;  %v6937_v32 = vld [vmem:[%s8335_s3 + $0x60] sm:$0xff]  }
 0x285   : > { %v3013_v21 = vmax.f32 %v2976_v15, %v2997_v61  ;;  %v3066_v51 = vrot.slane %v2977_v8, 1  ;;  %v2922_v7 = vadd.f32 %v6537_v11, %v7802_v16  ;;  %v6539_v44 = vadd.f32 %v2807_v1, %v7713_v25 }
 0x286   : > { %v2956_v54 = vmax.f32 %v2924_v0, 0.0  ;;  %v2925_v43 = vadd.f32 %v6538_v62, %v7802_v16 }
 0x287   : > { %3023 = vst.msk [vmem:[#allocation2 + $0x41] sm:$0x1] %vm3019_vm4, %v3013_v21  ;;  %v3082_v10 = vmax.f32 %v2977_v8, %v3066_v51  ;;  %v2954_v24 = vmax.f32 %v2922_v7, 0.0  ;;  %v2923_v22 = vadd.f32 %v6539_v44, %v7802_v16 }
 0x288   : > { %3032 = vst.msk [vmem:[#allocation2 + $0x40] sm:$0x4] %vm3028_vm5, %v3013_v21  ;;  %v2957_v12 = vmax.f32 %v2925_v43, 0.0 }
 0x289   : > { %3041 = vst.msk [vmem:[#allocation2 + $0x3f] sm:$0x10] %vm3037_vm6, %v3013_v21  ;;  %3106 = vst.msk [vmem:[#allocation2 + $0x43] sm:$0x10] %vm3037_vm6, %v3082_v10  ;;  %v2978_v25 = vmax.f32 %v2954_v24, %v2956_v54  ;;  %v2955_v19 = vmax.f32 %v2923_v22, 0.0  ;;  %v6292_v30 = vpop.f32.mrb[20].mxu0 }
 0x28a   : > { %3050 = vst.msk [vmem:[#allocation2 + $0x3e] sm:$0x40] %vm3046_vm7, %v3013_v21  ;;  %3114 = vst.msk [vmem:[#allocation2 + $0x42] sm:$0x40] %vm3046_vm7, %v3082_v10  ;;  %v6540_v37 = vadd.f32 %v6292_v30, %v7716_v35  ;;  %v2820_v27 = vpop.f32.mrb[21].mxu0 }
 0x28b   : > { %v7880_v55 = vld [vmem:[#allocation2 + $0x31] sm:$0xff]  ;;  %3090 = vst.msk [vmem:[#allocation2 + $0x45] sm:$0x1] %vm3019_vm4, %v3082_v10  ;;  %v2998_v50 = vrot.slane %v2978_v25, 1  ;;  %v2979_v57 = vmax.f32 %v2955_v19, %v2957_v12  ;;  %v6541_v63 = vadd.f32 %v2820_v27, %v7721_v38  ;;  %v6293_v48 = vpop.f32.mrb[22].mxu0  ;;  %v7905_v38 = vld [vmem:[%s8335_s3 + $0x20] sm:$0xff]  }
 0x28c   : > { %3098 = vst.msk [vmem:[#allocation2 + $0x44] sm:$0x4] %vm3028_vm5, %v3082_v10  ;;  %v7888_v45 = vpack.c.bf16 %v7880_v55, %v7860_v40  ;;  %v2928_v23 = vadd.f32 %v6540_v37, %v7802_v16  ;;  %v6542_v47 = vadd.f32 %v6293_v48, %v7723_v39  ;;  %v2823_v4 = vpop.f32.mrb[23].mxu0 }
 0x28d   : > { %v3014_v17 = vmax.f32 %v2978_v25, %v2998_v50  ;;  %v3067_v2 = vrot.slane %v2979_v57, 1  ;;  %v2926_v35 = vadd.f32 %v6541_v63, %v7802_v16  ;;  %v6543_v5 = vadd.f32 %v2823_v4, %v7725_v49 }
 0x28e   : > { %6307 = vmatmul.mubr.msk.bf16.vlgmr.msra.gmra.mrb[32].mxu1 %vm278_vm2, %v7888_v45  ;;  %v2960_v60 = vmax.f32 %v2928_v23, 0.0  ;;  %v2929_v20 = vadd.f32 %v6542_v47, %v7802_v16 }
 0x28f   : > { %6315 = vmatpush3.bf16.msra.mxu1 %v7796_v3  ;;  %3024 = vst.msk [vmem:[#allocation2 + $0x51] sm:$0x1] %vm3019_vm4, %v3014_v17  ;;  %v3083_v39 = vmax.f32 %v2979_v57, %v3067_v2  ;;  %v2958_v3 = vmax.f32 %v2926_v35, 0.0  ;;  %v2927_v49 = vadd.f32 %v6543_v5, %v7802_v16 }
 0x290   : > { %6316 = vmatprep.subr.bf16.mxu1 %v6928_v31  ;;  %3033 = vst.msk [vmem:[#allocation2 + $0x50] sm:$0x4] %vm3028_vm5, %v3014_v17  ;;  %v2961_v9 = vmax.f32 %v2929_v20, 0.0 }
 0x291   : > { %3042 = vst.msk [vmem:[#allocation2 + $0x4f] sm:$0x10] %vm3037_vm6, %v3014_v17  ;;  %3107 = vst.msk [vmem:[#allocation2 + $0x53] sm:$0x10] %vm3037_vm6, %v3083_v39  ;;  %v2980_v33 = vmax.f32 %v2958_v3, %v2960_v60  ;;  %v2959_v34 = vmax.f32 %v2927_v49, 0.0  ;;  %v6296_v15 = vpop.f32.mrb[24].mxu0 }
 0x292   : > { %3051 = vst.msk [vmem:[#allocation2 + $0x4e] sm:$0x40] %vm3046_vm7, %v3014_v17  ;;  %3115 = vst.msk [vmem:[#allocation2 + $0x52] sm:$0x40] %vm3046_vm7, %v3083_v39  ;;  %v6544_v52 = vadd.f32 %v6296_v15, %v7736_v56  ;;  %v2836_v58 = vpop.f32.mrb[25].mxu0  ;;  %v3119_v49 = vld [vmem:[#allocation2] sm:$0xff] }
 0x293   : > { %v7913_v14 = vld [vmem:[#allocation2 + $0x41] sm:$0xff]  ;;  %6317 = vmatpush3.bf16.msra.mxu1 %v6928_v31  ;;  %3091 = vst.msk [vmem:[#allocation2 + $0x55] sm:$0x1] %vm3019_vm4, %v3083_v39  ;;  %v2999_v59 = vrot.slane %v2980_v33, 1  ;;  %v2981_v61 = vmax.f32 %v2959_v34, %v2961_v9  ;;  %v6545_v8 = vadd.f32 %v2836_v58, %v7742_v6  ;;  %v6297_v11 = vpop.f32.mrb[26].mxu0  ;;  %v3120_v9 = vld [vmem:[#allocation2 + $0x10] sm:$0xff] }
 0x294   : > { %3099 = vst.msk [vmem:[#allocation2 + $0x54] sm:$0x4] %vm3028_vm5, %v3083_v39  ;;  %6326 = vmatprep.subr.bf16.mxu1 %v7905_v38  ;;  %v3567_v41 = vpack.c.bf16 %v7913_v14, %v7880_v55  ;;  %v2932_v13 = vadd.f32 %v6544_v52, %v7802_v16  ;;  %v6546_v0 = vadd.f32 %v6297_v11, %v7744_v28  ;;  %v2839_v62 = vpop.f32.mrb[27].mxu0  ;;  %v3122_v58 = vld [vmem:[#allocation2 + $0x30] sm:$0xff]  ;;  %v3123_v11 = vld [vmem:[#allocation2 + $0x40] sm:$0xff] }
 0x295   : > { %v3015_v1 = vmax.f32 %v2980_v33, %v2999_v59  ;;  %v3068_v21 = vrot.slane %v2981_v61, 1  ;;  %v2930_v51 = vadd.f32 %v6545_v8, %v7802_v16  ;;  %v6547_v7 = vadd.f32 %v2839_v62, %v7746_v18  ;;  %v6931_v62 = vld [vmem:[%s8335_s3 + $0x30] sm:$0xff]  }
 0x296   : > { %v2964_v44 = vmax.f32 %v2932_v13, 0.0  ;;  %v2933_v56 = vadd.f32 %v6546_v0, %v7802_v16  ;;  %v3127_v52 = vpack.c.bf16 %v3120_v9, %v3119_v49  ;;  %v6930_v13 = vld [vmem:[%s8335_s3 + $0x28] sm:$0xff]   ;;  %v5609_v49 = vld [vmem:[%s8336_s4] ss:$0 sm:$0xff] }
 0x297   : > { %3025 = vst.msk [vmem:[#allocation2 + $0x61] sm:$0x1] %vm3019_vm4, %v3015_v1  ;;  %v3084_v6 = vmax.f32 %v2981_v61, %v3068_v21  ;;  %v2962_v28 = vmax.f32 %v2930_v51, 0.0  ;;  %v2931_v54 = vadd.f32 %v6547_v7, %v7802_v16  ;;  %v3121_v61 = vld [vmem:[#allocation2 + $0x20] sm:$0xff]  ;;  %v3331_v51 = vld [vmem:[#allocation2 + $0x12] sm:$0xff] }
 0x298   : > { %3034 = vst.msk [vmem:[#allocation2 + $0x60] sm:$0x4] %vm3028_vm5, %v3015_v1  ;;  %v2965_v43 = vmax.f32 %v2933_v56, 0.0  ;;  %v7981_v8 = vpack.c.bf16 %v3122_v58, %v3121_v61  ;;  %v3330_v21 = vld [vmem:[#allocation2 + $0x2] sm:$0xff] }
 0x299   : > { %3043 = vst.msk [vmem:[#allocation2 + $0x5f] sm:$0x10] %vm3037_vm6, %v3015_v1  ;;  %3108 = vst.msk [vmem:[#allocation2 + $0x63] sm:$0x10] %vm3037_vm6, %v3084_v6  ;;  %v2982_v18 = vmax.f32 %v2962_v28, %v2964_v44  ;;  %v2963_v24 = vmax.f32 %v2931_v54, 0.0  ;;  %v6300_v22 = vpop.f32.mrb[28].mxu0  ;;  %v3338_v56 = vpack.c.bf16 %v3331_v51, %v3330_v21 }
 0x29a   : > { %3052 = vst.msk [vmem:[#allocation2 + $0x5e] sm:$0x40] %vm3046_vm7, %v3015_v1  ;;  %3116 = vst.msk [vmem:[#allocation2 + $0x62] sm:$0x40] %vm3046_vm7, %v3084_v6  ;;  %v6548_v25 = vadd.f32 %v6300_v22, %v7749_v26  ;;  %v2852_v19 = vpop.f32.mrb[29].mxu0  ;;  %v3332_v28 = vld [vmem:[#allocation2 + $0x22] sm:$0xff] }
 0x29b   : > { %v7934_v10 = vld [vmem:[#allocation2 + $0x51] sm:$0xff]  ;;  %3092 = vst.msk [vmem:[#allocation2 + $0x65] sm:$0x1] %vm3019_vm4, %v3084_v6  ;;  %v3000_v30 = vrot.slane %v2982_v18, 1  ;;  %v2983_v31 = vmax.f32 %v2963_v24, %v2965_v43  ;;  %v6549_v37 = vadd.f32 %v2852_v19, %v7751_v29  ;;  %v6301_v27 = vpop.f32.mrb[30].mxu0  ;;  %v3334_v43 = vld [vmem:[#allocation2 + $0x42] sm:$0xff] }
 0x29c   : > { %3100 = vst.msk [vmem:[#allocation2 + $0x64] sm:$0x4] %vm3028_vm5, %v3084_v6  ;;  %v7942_v12 = vpack.c.bf16 %v7934_v10, %v7913_v14  ;;  %v2936_v50 = vadd.f32 %v6548_v25, %v7802_v16  ;;  %v6550_v57 = vadd.f32 %v6301_v27, %v7753_v36  ;;  %v2855_v63 = vpop.f32.mrb[31].mxu0  ;;  %v3124_v59 = vld [vmem:[#allocation2 + $0x50] sm:$0xff]  ;;  %v6933_v22 = vld [vmem:[%s8335_s3 + $0x40] sm:$0xff]   ;;  %v6934_v27 = vld [vmem:[%s8335_s3 + $0x48] sm:$0xff]  }
 0x29d   : > { %v3016_v48 = vmax.f32 %v2982_v18, %v3000_v30  ;;  %v3069_v23 = vrot.slane %v2983_v31, 1  ;;  %v2934_v47 = vadd.f32 %v6549_v37, %v7802_v16  ;;  %v6551_v26 = vadd.f32 %v2855_v63, %v7755_v46  ;;  %v3335_v6 = vld [vmem:[#allocation2 + $0x52] sm:$0xff]  ;;  %v6938_v14 = vld [vmem:[%s8335_s3 + $0x68] sm:$0xff]  }
 0x29e   : > { %6310 = vmatprep.mubr.msk.bf16.mxu1 %vm278_vm2, %v7942_v12  ;;  %v2968_v4 = vmax.f32 %v2936_v50, 0.0  ;;  %v2937_v17 = vadd.f32 %v6550_v57, %v7802_v16  ;;  %v7986_v0 = vpack.c.bf16 %v3124_v59, %v3123_v11  ;;  %v6932_v18 = vld [vmem:[%s8335_s3 + $0x38] sm:$0xff]   ;;  %v8006_v24 = vpack.c.bf16 %v3335_v6, %v3334_v43  ;;  %v6935_v57 = vld [vmem:[%s8335_s3 + $0x50] sm:$0xff]  }
 0x29f   : > { %3026 = vst.msk [vmem:[#allocation2 + $0x71] sm:$0x1] %vm3019_vm4, %v3016_v48  ;;  %v3085_v29 = vmax.f32 %v2983_v31, %v3069_v23  ;;  %v2966_v36 = vmax.f32 %v2934_v47, 0.0  ;;  %v2935_v2 = vadd.f32 %v6551_v26, %v7802_v16  ;;  %v3452_v31 = vpack.c.bf16 %v3121_v61, %v3120_v9  ;;  %v6936_v23 = vld [vmem:[%s8335_s3 + $0x58] sm:$0xff]  }
 0x2a0   : > { %3035 = vst.msk [vmem:[#allocation2 + $0x70] sm:$0x4] %vm3028_vm5, %v3016_v48  ;;  %v2969_v35 = vmax.f32 %v2937_v17, 0.0  ;;  %v3453_v37 = vpack.c.bf16 %v3123_v11, %v3122_v58  ;;  %v3680_v26 = vpack.c.bf16 %v3332_v28, %v3331_v51 }
 0x2a1   : > { %3044 = vst.msk [vmem:[#allocation2 + $0x6f] sm:$0x10] %vm3037_vm6, %v3016_v48  ;;  %3109 = vst.msk [vmem:[#allocation2 + $0x73] sm:$0x10] %vm3037_vm6, %v3085_v29  ;;  %v2984_v46 = vmax.f32 %v2966_v36, %v2968_v4  ;;  %v2967_v5 = vmax.f32 %v2935_v2, 0.0  ;;  %v6941_v36 = vld [vmem:[%s8335_s3 + $0x80] sm:$0xff]  }
 0x2a2   : > { %3053 = vst.msk [vmem:[#allocation2 + $0x6e] sm:$0x40] %vm3046_vm7, %v3016_v48  ;;  %3117 = vst.msk [vmem:[#allocation2 + $0x72] sm:$0x40] %vm3046_vm7, %v3085_v29  ;;  %v3794_v2 = vld [vmem:[#allocation2 + $0x90] sm:$0xff] }
 0x2a3   : > { %3093 = vst.msk [vmem:[#allocation2 + $0x75] sm:$0x1] %vm3019_vm4, %v3085_v29  ;;  %v3001_v60 = vrot.slane %v2984_v46, 1  ;;  %v2985_v20 = vmax.f32 %v2967_v5, %v2969_v35  ;;  %v7966_v33 = vld [vmem:[#allocation2 + $0x61] sm:$0xff]  ;;  %v3908_v5 = vld [vmem:[#allocation2 + $0x91] sm:$0xff] }
 0x2a4   : > { %3101 = vst.msk [vmem:[#allocation2 + $0x74] sm:$0x4] %vm3028_vm5, %v3085_v29  ;;  %v3125_v7 = vld [vmem:[#allocation2 + $0x60] sm:$0xff]  ;;  %v3568_v47 = vpack.c.bf16 %v7966_v33, %v7934_v10  ;;  %v6939_v10 = vld [vmem:[%s8335_s3 + $0x70] sm:$0xff]   ;;  %v6940_v29 = vld [vmem:[%s8335_s3 + $0x78] sm:$0xff]  }
 0x2a5   : > { %v3017_v39 = vmax.f32 %v2984_v46, %v3001_v60  ;;  %v3070_v3 = vrot.slane %v2985_v20, 1  ;;  %v3336_v19 = vld [vmem:[#allocation2 + $0x62] sm:$0xff]  ;;  %v3454_v50 = vpack.c.bf16 %v3125_v7, %v3124_v59 }
 0x2a6   : > { %v6942_v46 = vld [vmem:[%s8335_s3 + $0x88] sm:$0xff]  }
 0x2a7   : > { %3027 = vst.msk [vmem:[#allocation2 + $0x81] sm:$0x1] %vm3019_vm4, %v3017_v39  ;;  %v3086_v16 = vmax.f32 %v2985_v20, %v3070_v3  ;;  %v6943_v20 = vld [vmem:[%s8337_s5 + $0x20] sm:$0xff]   ;;  %v6945_v3 = vld [vmem:[%s8337_s5 + $0x30] sm:$0xff]  }
 0x2a8   : > { %3036 = vst.msk [vmem:[#allocation2 + $0x80] sm:$0x4] %vm3028_vm5, %v3017_v39 }
 0x2a9   : > { %3045 = vst.msk [vmem:[#allocation2 + $0x7f] sm:$0x10] %vm3037_vm6, %v3017_v39  ;;  %3110 = vst.msk [vmem:[#allocation2 + $0x83] sm:$0x10] %vm3037_vm6, %v3086_v16 }
 0x2aa   : > { %3054 = vst.msk [vmem:[#allocation2 + $0x7e] sm:$0x40] %vm3046_vm7, %v3017_v39  ;;  %3118 = vst.msk [vmem:[#allocation2 + $0x82] sm:$0x40] %vm3046_vm7, %v3086_v16  ;;  %v6944_v39 = vld [vmem:[%s8337_s5 + $0x28] sm:$0xff]  }
 0x2ab   : > { %v7968_v34 = vld [vmem:[#allocation2 + $0x71] sm:$0xff]  ;;  %3094 = vst.msk [vmem:[#allocation2 + $0x85] sm:$0x1] %vm3019_vm4, %v3086_v16 }
 0x2ac   : > { %3102 = vst.msk [vmem:[#allocation2 + $0x84] sm:$0x4] %vm3028_vm5, %v3086_v16  ;;  %v7976_v15 = vpack.c.bf16 %v7968_v34, %v7966_v33  ;;  %v3126_v1 = vld [vmem:[#allocation2 + $0x70] sm:$0xff]  ;;  %v6946_v16 = vld [vmem:[%s8337_s5 + $0x38] sm:$0xff]  }
 0x2ad   : > { %v7996_v44 = vpack.c.bf16 %v3126_v1, %v3125_v7  ;;  %v3337_v25 = vld [vmem:[#allocation2 + $0x72] sm:$0xff] }
 0x2ae   : > { %6311 = vmatmul.mubr.msk.bf16.gmra.mrb[36].mxu1 %vm278_vm2, %v7976_v15  ;;  %v8015_v30 = vpack.c.bf16 %v3337_v25, %v3336_v19 }
 0x2af   : > { %6318 = vmatprep.mubr.msk.bf16.mxu1 %vm278_vm2, %v3127_v52 }
 0x2b3   : > { %v3451_v63 = vld [vmem:[#allocation2 + $0x80] sm:$0xff] }
 0x2b4   : > { %v3455_v48 = vpack.c.bf16 %v3451_v63, %v3126_v1  ;;  %v3565_v40 = vld [vmem:[#allocation2 + $0x81] sm:$0xff]  ;;  %v3798_v35 = vpack.c.bf16 %v3794_v2, %v3451_v63 }
 0x2b5   : > { %v3679_v4 = vld [vmem:[#allocation2 + $0x82] sm:$0xff]  ;;  %v3912_v60 = vpack.c.bf16 %v3908_v5, %v3565_v40 }
 0x2b6   : > { %6319 = vmatmul.mubr.msk.bf16.vlgmr.msra.gmra.mrb[32].mxu1 %vm278_vm2, %v7981_v8  ;;  %v3683_v17 = vpack.c.bf16 %v3679_v4, %v3337_v25  ;;  %v4207_v63 = vld [vmem:[#allocation3 + $0x1] sm:$0xff] }
 0x2b7   : > { %6327 = vmatpush3.bf16.msra.mxu1 %v7905_v38  ;;  %6322 = vmatprep.mubr.msk.bf16.mxu1 %vm278_vm2, %v7986_v0  ;;  %v3333_v38 = vld [vmem:[#allocation2 + $0x32] sm:$0xff]  ;;  %v6952_v5 = vld [vmem:[%s8337_s5 + $0x48] sm:$0xff]  }
 0x2b8   : > { %6328 = vmatprep.subr.bf16.mxu1 %v6930_v13  ;;  %v8001_v54 = vpack.c.bf16 %v3333_v38, %v3332_v28  ;;  %v3681_v55 = vpack.c.bf16 %v3334_v43, %v3333_v38 }
 0x2bb   : > { %6329 = vmatpush3.bf16.msra.mxu1 %v6930_v13 }
 0x2bc   : > { %6338 = vmatprep.subr.bf16.mxu1 %v6931_v62 }
 0x2be   : > { %6323 = vmatmul.mubr.msk.bf16.gmra.mrb[36].mxu1 %vm278_vm2, %v7996_v44 }
 0x2bf   : > { %6330 = vmatprep.mubr.msk.bf16.mxu1 %vm278_vm2, %v3338_v56 }
 0x2c6   : > { %6331 = vmatmul.mubr.msk.bf16.vlgmr.msra.gmra.mrb[32].mxu1 %vm278_vm2, %v8001_v54 }
 0x2c7   : > { %6339 = vmatpush3.bf16.msra.mxu1 %v6931_v62  ;;  %6334 = vmatprep.mubr.msk.bf16.mxu1 %vm278_vm2, %v8006_v24 }
 0x2c8   : > { %6340 = vmatprep.subr.bf16.mxu1 %v6932_v18 }
 0x2cb   : > { %6341 = vmatpush3.bf16.msra.mxu1 %v6932_v18 }
 0x2cc   : > { %6350 = vmatprep.subr.bf16.mxu1 %v6933_v22 }
 0x2ce   : > { %6335 = vmatmul.mubr.msk.bf16.gmra.mrb[36].mxu1 %vm278_vm2, %v8015_v30 }
 0x2cf   : > { %6342 = vmatprep.mubr.msk.bf16.mxu1 %vm278_vm2, %v3452_v31 }
 0x2d6   : > { %6343 = vmatmul.mubr.msk.bf16.vlgmr.msra.gmra.mrb[32].mxu1 %vm278_vm2, %v3453_v37 }
 0x2d7   : > { %6351 = vmatpush3.bf16.msra.mxu1 %v6933_v22  ;;  %6346 = vmatprep.mubr.msk.bf16.mxu1 %vm278_vm2, %v3454_v50 }
 0x2d8   : > { %6352 = vmatprep.subr.bf16.mxu1 %v6934_v27 }
 0x2db   : > { %6353 = vmatpush3.bf16.msra.mxu1 %v6934_v27 }
 0x2dc   : > { %6362 = vmatprep.subr.bf16.mxu1 %v6935_v57 }
 0x2de   : > { %6347 = vmatmul.mubr.msk.bf16.gmra.mrb[36].mxu1 %vm278_vm2, %v3455_v48 }
 0x2df   : > { %6354 = vmatprep.mubr.msk.bf16.mxu1 %vm278_vm2, %v3566_v53  ;;  %v3569_v53 = vpack.c.bf16 %v3565_v40, %v7968_v34 }
 0x2e6   : > { %6355 = vmatmul.mubr.msk.bf16.vlgmr.msra.gmra.mrb[32].mxu1 %vm278_vm2, %v3567_v41  ;;  %v3682_v41 = vpack.c.bf16 %v3336_v19, %v3335_v6 }
 0x2e7   : > { %6363 = vmatpush3.bf16.msra.mxu1 %v6935_v57  ;;  %6358 = vmatprep.mubr.msk.bf16.mxu1 %vm278_vm2, %v3568_v47 }
 0x2e8   : > { %6364 = vmatprep.subr.bf16.mxu1 %v6936_v23 }
 0x2eb   : > { %6365 = vmatpush3.bf16.msra.mxu1 %v6936_v23 }
 0x2ec   : > { %6374 = vmatprep.subr.bf16.mxu1 %v6937_v32 }
 0x2ee   : > { %6359 = vmatmul.mubr.msk.bf16.gmra.mrb[36].mxu1 %vm278_vm2, %v3569_v53 }
 0x2ef   : > { %6366 = vmatprep.mubr.msk.bf16.mxu1 %vm278_vm2, %v3680_v26 }
 0x2f6   : > { %6367 = vmatmul.mubr.msk.bf16.vlgmr.msra.gmra.mrb[32].mxu1 %vm278_vm2, %v3681_v55 }
 0x2f7   : > { %6375 = vmatpush3.bf16.msra.mxu1 %v6937_v32  ;;  %6370 = vmatprep.mubr.msk.bf16.mxu1 %vm278_vm2, %v3682_v41  ;;  %v4193_v32 = vld [vmem:[#allocation3] sm:$0xff] }
 0x2f8   : > { %6376 = vmatprep.subr.bf16.mxu1 %v6938_v14 }
 0x2fb   : > { %6377 = vmatpush3.bf16.msra.mxu1 %v6938_v14  ;;  %v6948_v14 = vld [vmem:[%s8337_s5 + $0x8] sm:$0xff]  }
 0x2fc   : > { %6386 = vmatprep.subr.bf16.mxu1 %v6939_v10 }
 0x2fe   : > { %6371 = vmatmul.mubr.msk.bf16.gmra.mrb[36].mxu1 %vm278_vm2, %v3683_v17  ;;  %v6951_v17 = vld [vmem:[%s8337_s5 + $0x40] sm:$0xff]  }
 0x2ff   : > { %6378 = vmatprep.mubr.msk.bf16.mxu1 %vm278_vm2, %v7981_v8 }
 0x306   : > { %6379 = vmatmul.mubr.msk.bf16.vlgmr.msra.gmra.mrb[32].mxu1 %vm278_vm2, %v7986_v0 }
 0x307   : > { %6387 = vmatpush3.bf16.msra.mxu1 %v6939_v10  ;;  %6382 = vmatprep.mubr.msk.bf16.mxu1 %vm278_vm2, %v7996_v44  ;;  %v6949_v10 = vld [vmem:[%s8337_s5 + $0x10] sm:$0xff]  }
 0x308   : > { %6388 = vmatprep.subr.bf16.mxu1 %v6940_v29 }
 0x30b   : > { %6389 = vmatpush3.bf16.msra.mxu1 %v6940_v29 }
 0x30c   : > { %6398 = vmatprep.subr.bf16.mxu1 %v6941_v36 }
 0x30e   : > { %6383 = vmatmul.mubr.msk.bf16.gmra.mrb[36].mxu1 %vm278_vm2, %v3798_v35 }
 0x30f   : > { %6390 = vmatprep.mubr.msk.bf16.mxu1 %vm278_vm2, %v7888_v45  ;;  %v4022_v45 = vld [vmem:[#allocation2 + $0x92] sm:$0xff] }
 0x316   : > { %6391 = vmatmul.mubr.msk.bf16.vlgmr.msra.gmra.mrb[32].mxu1 %vm278_vm2, %v7942_v12  ;;  %v4026_v12 = vpack.c.bf16 %v4022_v45, %v3679_v4  ;;  %v6950_v4 = vld [vmem:[%s8337_s5 + $0x18] sm:$0xff]   ;;  %v6953_v45 = vld [vmem:[%s8337_s5 + $0x50] sm:$0xff]  }
 0x317   : > { %6399 = vmatpush3.bf16.msra.mxu1 %v6941_v36  ;;  %6394 = vmatprep.mubr.msk.bf16.mxu1 %vm278_vm2, %v7976_v15  ;;  %v4380_v36 = vld [vmem:[#allocation3 + $0x2] sm:$0xff] }
 0x318   : > { %6400 = vmatprep.subr.bf16.mxu1 %v6942_v46 }
 0x31b   : > { %6401 = vmatpush3.bf16.msra.mxu1 %v6942_v46 }
 0x31c   : > { %6410 = vmatprep.subr.bf16.mxu1 %v6943_v20 }
 0x31e   : > { %6395 = vmatmul.mubr.msk.bf16.gmra.mrb[36].mxu1 %vm278_vm2, %v3912_v60 }
 0x31f   : > { %6402 = vmatprep.mubr.msk.bf16.mxu1 %vm278_vm2, %v8001_v54 }
 0x326   : > { %6403 = vmatmul.mubr.msk.bf16.vlgmr.msra.gmra.mrb[32].mxu1 %vm278_vm2, %v8006_v24 }
 0x327   : > { %6406 = vmatprep.mubr.msk.bf16.mxu1 %vm278_vm2, %v8015_v30  ;;  %6411 = vmatpush3.bf16.msra.mxu1 %v6943_v20  ;;  %v6955_v20 = vld [vmem:[%s8337_s5 + $0x60] sm:$0xff]  }
 0x328   : > { %6412 = vmatprep.subr.bf16.mxu1 %v6944_v39 }
 0x32b   : > { %6413 = vmatpush3.bf16.msra.mxu1 %v6944_v39 }
 0x32c   : > { %6414 = vmatprep.subr.bf16.mxu1 %v6945_v3 }
 0x32e   : > { %6407 = vmatmul.mubr.msk.bf16.gmra.mrb[36].mxu1 %vm278_vm2, %v4026_v12  ;;  %v6954_v12 = vld [vmem:[%s8337_s5 + $0x58] sm:$0xff]  }
 0x32f   : > { %6415 = vmatpush3.bf16.msra.mxu1 %v6945_v3 }
 0x330   : > { %6416 = vmatprep.subr.bf16.mxu1 %v6946_v16 }
 0x333   : > { %6417 = vmatpush3.bf16.msra.mxu1 %v6946_v16 }
 0x334   : > { %6422 = vmatprep.subr.bf16.mxu1 %v8121_v42 }
 0x3f9   : > { %v6404_v9 = vpop.f32.mrb[32].mxu1 }
 0x3fa   : > { %v4138_v33 = vadd.f32 %v6404_v9, %v5609_v49  ;;  %v4090_v34 = vpop.f32.mrb[33].mxu1  ;;  %v6957_v9 = vld [vmem:[%s8337_s5 + $0x70] sm:$0xff]  }
 0x3fb   : > { %v4136_v15 = vadd.f32 %v5609_v49, %v4090_v34  ;;  %v6405_v52 = vpop.f32.mrb[34].mxu1  ;;  %v6959_v34 = vld [vmem:[%s8337_s5 + $0x80] sm:$0xff]  }
 0x3fc   : > { %v4139_v58 = vadd.f32 %v6405_v52, %v5609_v49  ;;  %v4093_v59 = vpop.f32.mrb[35].mxu1  ;;  %v4146_v8 = vmax.f32 %v4138_v33, 0.0  ;;  %v6958_v33 = vld [vmem:[%s8337_s5 + $0x78] sm:$0xff]  }
 0x3fd   : > { %v4137_v61 = vadd.f32 %v5609_v49, %v4093_v59  ;;  %v4144_v13 = vmax.f32 %v4136_v15, 0.0 }
 0x3fe   : > { %v4147_v11 = vmax.f32 %v4139_v58, 0.0  ;;  %v6960_v58 = vld [vmem:[%s8337_s5 + $0x88] sm:$0xff]  }
 0x3ff   : > { %v4145_v0 = vmax.f32 %v4137_v61, 0.0  ;;  %v6961_v61 = vld [vmem:[%s8337_s5 + $0x90] sm:$0xff]  }
 0x400   : > { %v4153_v62 = vmax.f32 %v4146_v8, %v4147_v11  ;;  %v6962_v8 = vld [vmem:[%s8337_s5 + $0x98] sm:$0xff]   ;;  %v6963_v11 = vld [vmem:[%s8337_s5 + $0xa0] sm:$0xff]  }
 0x401   : > { %v4152_v1 = vmax.f32 %v4144_v13, %v4145_v0  ;;  %v6408_v21 = vpop.f32.mrb[36].mxu1 }
 0x402   : > { %v4161_v51 = vrot.slane %v4153_v62, 1  ;;  %v4142_v7 = vadd.f32 %v6408_v21, %v5609_v49  ;;  %v4106_v44 = vpop.f32.mrb[37].mxu1  ;;  %v6965_v21 = vld [vmem:[%s8337_s5 + $0xb0] sm:$0xff]  }
 0x403   : > { %v4160_v56 = vrot.slane %v4152_v1, 1  ;;  %v4140_v38 = vadd.f32 %v5609_v49, %v4106_v44  ;;  %v6409_v6 = vpop.f32.mrb[38].mxu1 }
 0x404   : > { %v4169_v28 = vmax.f32 %v4153_v62, %v4161_v51  ;;  %v4143_v54 = vadd.f32 %v6409_v6, %v5609_v49  ;;  %v4109_v43 = vpop.f32.mrb[39].mxu1  ;;  %v4150_v22 = vmax.f32 %v4142_v7, 0.0  ;;  %v6964_v62 = vld [vmem:[%s8337_s5 + $0xa8] sm:$0xff]   ;;  %v6966_v51 = vld [vmem:[%s8337_s5 + $0xb8] sm:$0xff]   ;;  %v6967_v7 = vld [vmem:[%s8337_s5 + $0xc0] sm:$0xff]  }
 0x405   : > { %v4168_v18 = vmax.f32 %v4152_v1, %v4160_v56  ;;  %v4141_v24 = vadd.f32 %v5609_v49, %v4109_v43  ;;  %v4148_v19 = vmax.f32 %v4140_v38, 0.0  ;;  %v6968_v38 = vld [vmem:[%s8337_s5 + $0xc8] sm:$0xff]   ;;  %v6969_v6 = vld [vmem:[%s8337_s5 + $0xd0] sm:$0xff]  }
 0x406   : > { %4175 = vst.msk [vmem:[#allocation3 + $0x21] sm:$0x1] %vm4173_vm10, %v4169_v28  ;;  %v4151_v25 = vmax.f32 %v4143_v54, 0.0  ;;  %v6971_v54 = vld [vmem:[%s8337_s5 + $0xe0] sm:$0xff]   ;;  %v4776_v43 = vld [vmem:[#allocation3 + $0x50] sm:$0xff] }
 0x407   : > { %4180 = vst.msk [vmem:[#allocation3 + $0x20] sm:$0x4] %vm4178_vm11, %v4169_v28  ;;  %4179 = vst.msk [vmem:[#allocation3 + $0x10] sm:$0x4] %vm4178_vm11, %v4168_v18  ;;  %v4149_v30 = vmax.f32 %v4141_v24, 0.0  ;;  %v6972_v24 = vld [vmem:[%s8337_s5 + $0xe8] sm:$0xff]  }
 0x408   : > { %4185 = vst.msk [vmem:[#allocation3 + $0x1f] sm:$0x10] %vm4183_vm12, %v4169_v28  ;;  %4184 = vst.msk [vmem:[#allocation3 + $0xf] sm:$0x10] %vm4183_vm12, %v4168_v18  ;;  %v4155_v31 = vmax.f32 %v4150_v22, %v4151_v25  ;;  %v6973_v22 = vld [vmem:[%s8337_s5 + $0xf0] sm:$0xff]   ;;  %v6974_v25 = vld [vmem:[%s8337_s5 + $0xf8] sm:$0xff]  }
 0x409   : > { %4190 = vst.msk [vmem:[#allocation3 + $0x1e] sm:$0x40] %vm4188_vm13, %v4169_v28  ;;  %4189 = vst.msk [vmem:[#allocation3 + $0xe] sm:$0x40] %vm4188_vm13, %v4168_v18  ;;  %v4154_v37 = vmax.f32 %v4148_v19, %v4149_v30  ;;  %v6970_v28 = vld [vmem:[%s8337_s5 + $0xd8] sm:$0xff]   ;;  %v6975_v19 = vld [vmem:[%s8337_s5 + $0x100] sm:$0xff]  }
 0x40a   : > { %4174 = vst.msk [vmem:[#allocation3 + $0x11] sm:$0x1] %vm4173_vm10, %v4168_v18  ;;  %v4163_v27 = vrot.slane %v4155_v31, 1  ;;  %v4874_v30 = vld [vmem:[#allocation3 + $0x51] sm:$0xff] }
 0x40b   : > { %v4162_v50 = vrot.slane %v4154_v37, 1 }
 0x40c   : > { %v4171_v57 = vmax.f32 %v4155_v31, %v4163_v27  ;;  %v6977_v27 = vld [vmem:[%s8337_s5 + $0x110] sm:$0xff]  }
 0x40d   : > { %v4170_v48 = vmax.f32 %v4154_v37, %v4162_v50  ;;  %v6976_v37 = vld [vmem:[%s8337_s5 + $0x108] sm:$0xff]   ;;  %v6978_v50 = vld [vmem:[%s8337_s5 + $0x118] sm:$0xff]  }
 0x40e   : > { %4177 = vst.msk [vmem:[#allocation3 + $0x41] sm:$0x1] %vm4173_vm10, %v4171_v57 }
 0x40f   : > { %4182 = vst.msk [vmem:[#allocation3 + $0x40] sm:$0x4] %vm4178_vm11, %v4171_v57  ;;  %4181 = vst.msk [vmem:[#allocation3 + $0x30] sm:$0x4] %vm4178_vm11, %v4170_v48 }
 0x410   : > { %4187 = vst.msk [vmem:[#allocation3 + $0x3f] sm:$0x10] %vm4183_vm12, %v4171_v57  ;;  %4186 = vst.msk [vmem:[#allocation3 + $0x2f] sm:$0x10] %vm4183_vm12, %v4170_v48  ;;  %v8147_v53 = vld [vmem:[#allocation3 + $0x21] sm:$0xff]  ;;  %v4381_v2 = vld [vmem:[#allocation3 + $0x12] sm:$0xff] }
 0x411   : > { %4192 = vst.msk [vmem:[#allocation3 + $0x3e] sm:$0x40] %vm4188_vm13, %v4171_v57  ;;  %v8139_v23 = vld [vmem:[#allocation3 + $0x11] sm:$0xff]  ;;  %4191 = vst.msk [vmem:[#allocation3 + $0x2e] sm:$0x40] %vm4188_vm13, %v4170_v48  ;;  %v4195_v35 = vld [vmem:[#allocation3 + $0x20] sm:$0xff]  ;;  %v4384_v60 = vpack.c.bf16 %v4381_v2, %v4380_v36 }
 0x412   : > { %4176 = vst.msk [vmem:[#allocation3 + $0x31] sm:$0x1] %vm4173_vm10, %v4170_v48  ;;  %v4211_v47 = vpack.c.bf16 %v8139_v23, %v4207_v63  ;;  %v4194_v40 = vld [vmem:[#allocation3 + $0x10] sm:$0xff]  ;;  %v4382_v3 = vld [vmem:[#allocation3 + $0x22] sm:$0xff]  ;;  %v4580_v59 = vpack.c.bf16 %v8147_v53, %v8139_v23  ;;  %v5728_v48 = vld [vmem:[%s8338_s6] ss:$0 sm:$0xff] }
 0x413   : > { %v4197_v41 = vpack.c.bf16 %v4194_v40, %v4193_v32  ;;  %v4482_v49 = vpack.c.bf16 %v4195_v35, %v4194_v40  ;;  %v4678_v1 = vpack.c.bf16 %v4382_v3, %v4381_v2  ;;  %v4972_v57 = vld [vmem:[#allocation3 + $0x52] sm:$0xff] }
 0x414   : > { %6418 = vmatprep.mubr.msk.bf16.mxu1 %vm300_vm8, %v4211_v47 }
 0x418   : > { %v4383_v39 = vld [vmem:[#allocation3 + $0x32] sm:$0xff]  ;;  %v4481_v15 = vld [vmem:[#allocation3 + $0x40] sm:$0xff] }
 0x419   : > { %v8149_v26 = vld [vmem:[#allocation3 + $0x31] sm:$0xff]  ;;  %v8188_v16 = vpack.c.bf16 %v4383_v39, %v4382_v3  ;;  %v4579_v13 = vld [vmem:[#allocation3 + $0x41] sm:$0xff]  ;;  %v4778_v18 = vpack.c.bf16 %v4776_v43, %v4481_v15 }
 0x41a   : > { %v8153_v55 = vpack.c.bf16 %v8149_v26, %v8147_v53  ;;  %v4196_v29 = vld [vmem:[#allocation3 + $0x30] sm:$0xff]  ;;  %v4581_v0 = vpack.c.bf16 %v4579_v13, %v8149_v26  ;;  %v4677_v44 = vld [vmem:[#allocation3 + $0x42] sm:$0xff]  ;;  %v4876_v31 = vpack.c.bf16 %v4874_v30, %v4579_v13 }
 0x41b   : > { %v8171_v46 = vpack.c.bf16 %v4196_v29, %v4195_v35  ;;  %v4483_v52 = vpack.c.bf16 %v4481_v15, %v4196_v29  ;;  %v4679_v56 = vpack.c.bf16 %v4677_v44, %v4383_v39  ;;  %v4974_v63 = vpack.c.bf16 %v4972_v57, %v4677_v44 }
 0x41c   : > { %6419 = vmatmul.mubr.msk.bf16.vlgmr.msra.gmra.mrb[40].mxu1 %vm300_vm8, %v8153_v55 }
 0x41d   : > { %6423 = vmatpush3.bf16.msra.mxu1 %v8121_v42  ;;  %6430 = vmatprep.mubr.msk.bf16.mxu1 %vm300_vm8, %v4197_v41  ;;  %v6956_v42 = vld [vmem:[%s8337_s5 + $0x68] sm:$0xff]  }
 0x41e   : > { %6424 = vmatprep.subr.bf16.mxu1 %v6948_v14 }
 0x421   : > { %6425 = vmatpush3.bf16.msra.mxu1 %v6948_v14 }
 0x422   : > { %6426 = vmatprep.subr.bf16.mxu1 %v6949_v10 }
 0x425   : > { %6427 = vmatpush3.bf16.msra.mxu1 %v6949_v10 }
 0x426   : > { %6428 = vmatprep.subr.bf16.mxu1 %v6950_v4 }
 0x429   : > { %6429 = vmatpush3.bf16.msra.mxu1 %v6950_v4 }
 0x42a   : > { %6434 = vmatprep.subr.bf16.mxu1 %v6951_v17 }
 0x42c   : > { %6431 = vmatmul.mubr.msk.bf16.vlgmr.msra.gmra.mrb[40].mxu1 %vm300_vm8, %v8171_v46 }
 0x42d   : > { %6435 = vmatpush3.bf16.msra.mxu1 %v6951_v17  ;;  %6442 = vmatprep.mubr.msk.bf16.mxu1 %vm300_vm8, %v4384_v60 }
 0x42e   : > { %6436 = vmatprep.subr.bf16.mxu1 %v6952_v5 }
 0x431   : > { %6437 = vmatpush3.bf16.msra.mxu1 %v6952_v5 }
 0x432   : > { %6438 = vmatprep.subr.bf16.mxu1 %v6953_v45 }
 0x435   : > { %6439 = vmatpush3.bf16.msra.mxu1 %v6953_v45 }
 0x436   : > { %6440 = vmatprep.subr.bf16.mxu1 %v6954_v12 }
 0x439   : > { %6441 = vmatpush3.bf16.msra.mxu1 %v6954_v12 }
 0x43a   : > { %6446 = vmatprep.subr.bf16.mxu1 %v6955_v20 }
 0x43c   : > { %6443 = vmatmul.mubr.msk.bf16.vlgmr.msra.gmra.mrb[40].mxu1 %vm300_vm8, %v8188_v16 }
 0x43d   : > { %6447 = vmatpush3.bf16.msra.mxu1 %v6955_v20  ;;  %6454 = vmatprep.mubr.msk.bf16.mxu1 %vm300_vm8, %v4482_v49 }
 0x43e   : > { %6448 = vmatprep.subr.bf16.mxu1 %v6956_v42 }
 0x441   : > { %6449 = vmatpush3.bf16.msra.mxu1 %v6956_v42 }
 0x442   : > { %6450 = vmatprep.subr.bf16.mxu1 %v6957_v9 }
 0x445   : > { %6451 = vmatpush3.bf16.msra.mxu1 %v6957_v9 }
 0x446   : > { %6452 = vmatprep.subr.bf16.mxu1 %v6958_v33 }
 0x449   : > { %6453 = vmatpush3.bf16.msra.mxu1 %v6958_v33 }
 0x44a   : > { %6458 = vmatprep.subr.bf16.mxu1 %v6959_v34 }
 0x44c   : > { %6455 = vmatmul.mubr.msk.bf16.vlgmr.msra.gmra.mrb[40].mxu1 %vm300_vm8, %v4483_v52 }
 0x44d   : > { %6459 = vmatpush3.bf16.msra.mxu1 %v6959_v34  ;;  %6466 = vmatprep.mubr.msk.bf16.mxu1 %vm300_vm8, %v4580_v59 }
 0x44e   : > { %6460 = vmatprep.subr.bf16.mxu1 %v6960_v58 }
 0x451   : > { %6461 = vmatpush3.bf16.msra.mxu1 %v6960_v58 }
 0x452   : > { %6462 = vmatprep.subr.bf16.mxu1 %v6961_v61 }
 0x455   : > { %6463 = vmatpush3.bf16.msra.mxu1 %v6961_v61 }
 0x456   : > { %6464 = vmatprep.subr.bf16.mxu1 %v6962_v8 }
 0x459   : > { %6465 = vmatpush3.bf16.msra.mxu1 %v6962_v8 }
 0x45a   : > { %6470 = vmatprep.subr.bf16.mxu1 %v6963_v11 }
 0x45c   : > { %6467 = vmatmul.mubr.msk.bf16.vlgmr.msra.gmra.mrb[40].mxu1 %vm300_vm8, %v4581_v0 }
 0x45d   : > { %6471 = vmatpush3.bf16.msra.mxu1 %v6963_v11  ;;  %6478 = vmatprep.mubr.msk.bf16.mxu1 %vm300_vm8, %v4678_v1 }
 0x45e   : > { %6472 = vmatprep.subr.bf16.mxu1 %v6964_v62 }
 0x461   : > { %6473 = vmatpush3.bf16.msra.mxu1 %v6964_v62 }
 0x462   : > { %6474 = vmatprep.subr.bf16.mxu1 %v6965_v21 }
 0x465   : > { %6475 = vmatpush3.bf16.msra.mxu1 %v6965_v21 }
 0x466   : > { %6476 = vmatprep.subr.bf16.mxu1 %v6966_v51 }
 0x469   : > { %6477 = vmatpush3.bf16.msra.mxu1 %v6966_v51 }
 0x46a   : > { %6482 = vmatprep.subr.bf16.mxu1 %v6967_v7 }
 0x46c   : > { %6479 = vmatmul.mubr.msk.bf16.vlgmr.msra.gmra.mrb[40].mxu1 %vm300_vm8, %v4679_v56 }
 0x46d   : > { %6483 = vmatpush3.bf16.msra.mxu1 %v6967_v7  ;;  %6490 = vmatprep.mubr.msk.bf16.mxu1 %vm300_vm8, %v8171_v46 }
 0x46e   : > { %6484 = vmatprep.subr.bf16.mxu1 %v6968_v38 }
 0x471   : > { %6485 = vmatpush3.bf16.msra.mxu1 %v6968_v38 }
 0x472   : > { %6486 = vmatprep.subr.bf16.mxu1 %v6969_v6 }
 0x475   : > { %6487 = vmatpush3.bf16.msra.mxu1 %v6969_v6 }
 0x476   : > { %6488 = vmatprep.subr.bf16.mxu1 %v6970_v28 }
 0x479   : > { %6489 = vmatpush3.bf16.msra.mxu1 %v6970_v28 }
 0x47a   : > { %6494 = vmatprep.subr.bf16.mxu1 %v6971_v54 }
 0x47c   : > { %6491 = vmatmul.mubr.msk.bf16.vlgmr.msra.gmra.mrb[40].mxu1 %vm300_vm8, %v4778_v18 }
 0x47d   : > { %6495 = vmatpush3.bf16.msra.mxu1 %v6971_v54  ;;  %6502 = vmatprep.mubr.msk.bf16.mxu1 %vm300_vm8, %v8153_v55 }
 0x47e   : > { %6496 = vmatprep.subr.bf16.mxu1 %v6972_v24 }
 0x481   : > { %6497 = vmatpush3.bf16.msra.mxu1 %v6972_v24 }
 0x482   : > { %6498 = vmatprep.subr.bf16.mxu1 %v6973_v22 }
 0x485   : > { %6499 = vmatpush3.bf16.msra.mxu1 %v6973_v22 }
 0x486   : > { %6500 = vmatprep.subr.bf16.mxu1 %v6974_v25 }
 0x489   : > { %6501 = vmatpush3.bf16.msra.mxu1 %v6974_v25 }
 0x48a   : > { %6506 = vmatprep.subr.bf16.mxu1 %v6975_v19 }
 0x48c   : > { %6503 = vmatmul.mubr.msk.bf16.vlgmr.msra.gmra.mrb[40].mxu1 %vm300_vm8, %v4876_v31 }
 0x48d   : > { %6507 = vmatpush3.bf16.msra.mxu1 %v6975_v19  ;;  %6514 = vmatprep.mubr.msk.bf16.mxu1 %vm300_vm8, %v8188_v16 }
 0x48e   : > { %6508 = vmatprep.subr.bf16.mxu1 %v6976_v37 }
 0x491   : > { %6509 = vmatpush3.bf16.msra.mxu1 %v6976_v37 }
 0x492   : > { %6510 = vmatprep.subr.bf16.mxu1 %v6977_v27 }
 0x495   : > { %6511 = vmatpush3.bf16.msra.mxu1 %v6977_v27 }
 0x496   : > { %6512 = vmatprep.subr.bf16.mxu1 %v6978_v50 }
 0x499   : > { %6513 = vmatpush3.bf16.msra.mxu1 %v6978_v50 }
 0x49c   : > { %6515 = vmatmul.mubr.msk.bf16.vlgmr.msra.gmra.mrb[40].mxu1 %vm300_vm8, %v4974_v63 }
 0x56f   : > { %v6516_v23 = vpop.f32.mrb[40].mxu1 }
 0x570   : > { %v5076_v47 = vadd.f32 %v6516_v23, %v5728_v48  ;;  %v5048_v32 = vpop.f32.mrb[41].mxu1 }
 0x571   : > { %v5074_v40 = vadd.f32 %v5728_v48, %v5048_v32  ;;  %v6517_v53 = vpop.f32.mrb[42].mxu1 }
 0x572   : > { %v5077_v26 = vadd.f32 %v6517_v53, %v5728_v48  ;;  %v5051_v55 = vpop.f32.mrb[43].mxu1  ;;  %v5080_v41 = vmax.f32 %v5076_v47, 0.0 }
 0x573   : > { %v5075_v14 = vadd.f32 %v5728_v48, %v5051_v55  ;;  %v5078_v4 = vmax.f32 %v5074_v40, 0.0 }
 0x574   : > { %v5081_v10 = vmax.f32 %v5077_v26, 0.0 }
 0x575   : > { %v5079_v17 = vmax.f32 %v5075_v14, 0.0 }
 0x576   : > { %v5083_v29 = vmax.f32 %v5080_v41, %v5081_v10 }
 0x577   : > { %v5082_v36 = vmax.f32 %v5078_v4, %v5079_v17 }
 0x578   : > { %v5087_v2 = vrot.slane %v5083_v29, 1 }
 0x579   : > { %v5086_v35 = vrot.slane %v5082_v36, 1 }
 0x57a   : > { %v5091_v46 = vmax.f32 %v5083_v29, %v5087_v2 }
 0x57b   : > { %v5090_v5 = vmax.f32 %v5082_v36, %v5086_v35 }
 0x57c   : > { %5093 = vst [vmem:[%s271_s9 + $0x2] sm:$0x1] %v5091_v46  ;;  %5095 = vst [vmem:[%s271_s9 + $0x1] sm:$0x4] %v5091_v46 }
 0x57d   : > { %5092 = vst [vmem:[%s271_s9] sm:$0x1] %v5090_v5  ;;  %5094 = vst [vmem:[%s271_s9 - $0x1] sm:$0x4] %v5090_v5 }
 0x57e   : > { %6992 = shalt.err (!%p6989_p3)
}
 0x57f   : > { %s6993_s21 = scalar_lea.hbm %s8287_s17, 64  ;;  %s6997_s8 = scalar_lea.hbm %s8339_s7, 128 }
 0x580   : > { %p6994_p4 = scmp.ne.s32.totalorder %s8287_s17, %s6993_s21  ;;  %p6998_p9 = scmp.lt.u32.totalorder %s8287_s17, %s8339_s7 }
 0x581   : > { %p6999_p10 = scmp.lt.u32.totalorder %s6997_s8, %s6993_s21  ;;  %p7001_p12 = scmp.lt.u32.totalorder %s6993_s21, %s8287_s17 }
 0x582   : > { %p6995_p7 = pnand %p6994_p4, %p7125_p5 }
 0x583   : > { %p7000_p11 = por %p6999_p10, %p6998_p9 }
 0x584   : > { %p6996_p8 = pneg %p6995_p7 }
 0x585   : > { %p7002_p13 = por %p7001_p12, %p7000_p11 }
 0x587   : > { %p7003_p0 = pnand %p7002_p13, %p6996_p8 }
 0x589   : > { %7006 = shalt.err (!%p7003_p0)
}
 0x58a   : > { %s7045_s15 = smov 32   ;;  %s7046_s16 = smov 2  }
 0x58b   : > { %6883 = dma.vmem_to_hbm [thread:$0]  (%p7125_p5), %s8289_s13, 64, %s8287_s17, %s8291_s18, %s7045_s15, %s7045_s15, %s7046_s16  }
 0x58c PF: > { %p6889_p1 = scmp.ge.s32.totalorder %s7041_s27, 2  ;;  %s5125_s28 = sand.u32 1, %s7029_s24  }
 0x58d   : > { %s5126_s19 = scalar_lea.sflag [#allocation5], %s5125_s28 }
 0x58e   : > { %p6886_p2 = pnand %p6889_p1, %p7129_p6 }
 0x590   : > { %7024 = dma.done.wait (!%p6886_p2), %s5126_s19, 64  }
 0x591   : > { %7026 = vsyncadd (!%p6886_p2), %s5126_s19, 4294967232  ;;  %p17_p3 = scmp.ge.s32.totalorder %s7112_s30, 4   ;;  %s8342_s24 = smov %s7033_s25 }
 0x592   : > { %s8343_s25 = smov %s7037_s26  ;;  %s8344_s26 = smov %s7123_s10 }
 0x593   : > { %s8345_s27 = smov %s7112_s30  ;;  %19 = sbr.rel (!%p17_p3) target bundleno = 3 (0x3), region = 113 }
 0x59a   :  { %5131 = vsyncpa [#allocation5], 1 }
 0x59b   :  { %5133 = vsyncpa [#allocation5 + $0x1], 1 }

</bundles_post_ra>
